<compile_context>
chip_gen: v5e
topology: v5e:2x2
jax: 0.10.0
libtpu: 0.0.40
codegen_flags: <defaults>
</compile_context>

<pallas_src>
import math

import jax
import jax.numpy as jnp
from jax.experimental import pallas as pl
from jax.experimental.pallas import tpu as pltpu  # noqa: F401  (TPU backend)

# ----------------------- configuration -----------------------
NUM_VOCAB = 20
NUM_EDGE_TYPE = 5
HIDDEN = 32          # hidden_dim
NUM_HEADS = 4
OUT_DIM = 32         # out_dim (== hidden_dim here)
NUM_LAYERS = 2
POS_ENC_DIM = 8
N_CLASS = 3
N_NODES = 8
HEAD_DIM = HIDDEN // NUM_HEADS


# ----------------------- single fused Pallas kernel -----------------------
def _forward_kernel(*refs):
    (h0_ref, lap_ref, e0_ref, maskf_ref,
     pdst_ref, psrc_ref, pdstt_ref,
     wlap_ref, blap_ref, bhead_ref,
     wqkv_ref, we_ref,
     woh_ref, boh_ref, woe_ref, boe_ref,
     ln1hg_ref, ln1hb_ref, ln1eg_ref, ln1eb_ref,
     wf1h_ref, bf1h_ref, wf2h_ref, bf2h_ref,
     wf1e_ref, bf1e_ref, wf2e_ref, bf2e_ref,
     ln2hg_ref, ln2hb_ref, ln2eg_ref, ln2eb_ref,
     w0_ref, b0_ref, w1_ref, b1_ref, w2_ref, b2_ref,
     out_ref) = refs

    hdim = HIDDEN
    scale = 1.0 / math.sqrt(HEAD_DIM)

    def dot(a, b):
        return jnp.dot(a, b, preferred_element_type=jnp.float32)

    def layernorm(x, g, b):
        mu = jnp.mean(x, axis=-1, keepdims=True)
        var = jnp.mean((x - mu) * (x - mu), axis=-1, keepdims=True)
        return (x - mu) * jax.lax.rsqrt(var + 1e-5) * g + b

    # ---- input embedding + laplacian positional encoding (dropout = identity)
    h = h0_ref[...] + dot(lap_ref[...], wlap_ref[...]) + blap_ref[...]   # [N, H]
    e = e0_ref[...]                    # [N*N, H]  edge feats, dst-major flatten
    maskf = maskf_ref[...]             # [N*N, 1]  adjacency mask (dst-major)
    pdst = pdst_ref[...]               # [N*N, N]  one-hot of dst(p)
    psrc = psrc_ref[...]               # [N*N, N]  one-hot of src(p)
    pdst_t = pdstt_ref[...]            # [N, N*N]
    bhead = bhead_ref[...]             # [H, H]    block-diag ones (per-head sum+bcast)

    for l in range(NUM_LAYERS):        # static unroll, weights stay in VMEM
        h_in1, e_in1 = h, e

        # fused Q|K|V projection (bias=False) and edge projection (bias=False)
        qkv = dot(h, wqkv_ref[l])                      # [N, 3H]
        q = qkv[:, :hdim]
        k = qkv[:, hdim:2 * hdim]
        v = qkv[:, 2 * hdim:]
        pe = dot(e, we_ref[l])                         # [N*N, H]

        # broadcast node features to edge rows via constant 0/1 matmuls (MXU)
        q_b = dot(pdst, q)                             # [N*N, H]  Q[dst(p)]
        k_b = dot(psrc, k)                             # [N*N, H]  K[src(p)]
        v_b = dot(psrc, v)                             # [N*N, H]  V[src(p)]

        # per-dim scores; this is exactly e_out of the reference layer
        e_att = q_b * k_b * scale * pe                 # [N*N, H]

        # per-head sum over dh, broadcast back across that head's lanes (MXU)
        s_sum = dot(e_att, bhead)                      # [N*N, H]
        # TODO(synk): exp(clamp(.)) matches the reference (no running-max softmax);
        # exp is also evaluated on masked-out (non-edge) rows before masking.
        s_exp = jnp.exp(jnp.clip(s_sum, -5.0, 5.0)) * maskf

        # per-destination aggregation as matmuls with pdst^T
        wv = dot(pdst_t, s_exp * v_b)                  # [N, H]
        z = dot(pdst_t, s_exp)                         # [N, H] (const within a head)
        h_att = wv * pl.reciprocal(z + 1e-6, approx=True)

        # O projections + residual + LayerNorm
        h2 = dot(h_att, woh_ref[l]) + boh_ref[l]
        e2 = dot(e_att, woe_ref[l]) + boe_ref[l]
        h = layernorm(h_in1 + h2, ln1hg_ref[l], ln1hb_ref[l])
        e = layernorm(e_in1 + e2, ln1eg_ref[l], ln1eb_ref[l])

        # FFNs + residual + LayerNorm
        h_in2, e_in2 = h, e
        hf = jnp.maximum(dot(h, wf1h_ref[l]) + bf1h_ref[l], 0.0)
        hf = dot(hf, wf2h_ref[l]) + bf2h_ref[l]
        ef = jnp.maximum(dot(e, wf1e_ref[l]) + bf1e_ref[l], 0.0)
        ef = dot(ef, wf2e_ref[l]) + bf2e_ref[l]
        h = layernorm(h_in2 + hf, ln2hg_ref[l], ln2hb_ref[l])
        e = layernorm(e_in2 + ef, ln2eg_ref[l], ln2eb_ref[l])

    # ---- mean readout + MLPReadout (32 -> 16 -> 8 -> n_class), all fused
    hg = jnp.mean(h, axis=0, keepdims=True)            # [1, OUT_DIM]
    y = jnp.maximum(dot(hg, w0_ref[...]) + b0_ref[...], 0.0)
    y = jnp.maximum(dot(y, w1_ref[...]) + b1_ref[...], 0.0)
    y = dot(y, w2_ref[...]) + b2_ref[...]
    out_ref[...] = y


# ----------------------- wrapper (embedding gathers + weight packing) ------
def forward(params, h_idx, e_idx, mask, lap_pos):
    n, H = N_NODES, HIDDEN

    # node / edge embedding gathers kept as JAX glue
    h0 = jnp.take(params["emb_h"], h_idx, axis=0)                      # [N, H]
    e0 = jnp.take(params["emb_e"], e_idx.reshape(-1), axis=0)          # [N*N, H]
    maskf = mask.reshape(n * n, 1)

    # constant gather/scatter and head-reduction matrices (tiny, VMEM-resident)
    p_idx = jnp.arange(n * n)
    dst = p_idx // n
    src = p_idx % n
    node_ids = jnp.arange(n)
    pdst = (dst[:, None] == node_ids[None, :]).astype(jnp.float32)     # [N*N, N]
    psrc = (src[:, None] == node_ids[None, :]).astype(jnp.float32)     # [N*N, N]
    pdst_t = pdst.T                                                    # [N, N*N]
    lane = jnp.arange(H)
    bhead = ((lane[:, None] // HEAD_DIM) ==
             (lane[None, :] // HEAD_DIM)).astype(jnp.float32)          # [H, H]

    layers = params["layers"]
    wqkv = jnp.stack(
        [jnp.concatenate([lp["Wq"], lp["Wk"], lp["Wv"]], axis=1) for lp in layers],
        axis=0)                                                        # [L, H, 3H]

    def stk(name):                                   # weights -> [L, in, out]
        return jnp.stack([lp[name] for lp in layers], axis=0)

    def stk_b(name):                                 # biases / LN -> [L, 1, D]
        return jnp.stack([lp[name].reshape(1, -1) for lp in layers], axis=0)

    args = [
        h0, lap_pos, e0, maskf,
        pdst, psrc, pdst_t,
        params["W_lap"], params["b_lap"].reshape(1, H), bhead,
        wqkv, stk("We"),
        stk("WOh"), stk_b("bOh"), stk("WOe"), stk_b("bOe"),
        stk_b("ln1_h_g"), stk_b("ln1_h_b"), stk_b("ln1_e_g"), stk_b("ln1_e_b"),
        stk("Wffn1_h"), stk_b("bffn1_h"), stk("Wffn2_h"), stk_b("bffn2_h"),
        stk("Wffn1_e"), stk_b("bffn1_e"), stk("Wffn2_e"), stk_b("bffn2_e"),
        stk_b("ln2_h_g"), stk_b("ln2_h_b"), stk_b("ln2_e_g"), stk_b("ln2_e_b"),
        params["mlp_W0"], params["mlp_b0"].reshape(1, -1),
        params["mlp_W1"], params["mlp_b1"].reshape(1, -1),
        params["mlp_W2"], params["mlp_b2"].reshape(1, -1),
    ]

    # single pallas_call, no grid: every operand is a full-array VMEM block.
    return pl.pallas_call(
        _forward_kernel,
        out_shape=jax.ShapeDtypeStruct((1, N_CLASS), jnp.float32),
    )(*args)


# ----------------------- deterministic parameter init -----------------------
def init_params(key):
    keys = iter(jax.random.split(key, 256))

    def w(shape, scale=0.1):
        return (scale * jax.random.normal(next(keys), shape)).astype(jnp.float32)

    def b(shape, scale=0.01):
        return (scale * jax.random.normal(next(keys), shape)).astype(jnp.float32)

    params = {
        "emb_h": w((NUM_VOCAB, HIDDEN)),
        "emb_e": w((NUM_EDGE_TYPE, HIDDEN)),
        "W_lap": w((POS_ENC_DIM, HIDDEN)),
        "b_lap": b((HIDDEN,)),
        "layers": [],
    }
    H = HIDDEN
    for _ in range(NUM_LAYERS):
        lp = {
            "Wq": w((H, H)), "Wk": w((H, H)), "Wv": w((H, H)), "We": w((H, H)),
            "WOh": w((H, H)), "bOh": b((H,)),
            "WOe": w((H, H)), "bOe": b((H,)),
            "ln1_h_g": jnp.ones((H,), jnp.float32), "ln1_h_b": jnp.zeros((H,), jnp.float32),
            "ln1_e_g": jnp.ones((H,), jnp.float32), "ln1_e_b": jnp.zeros((H,), jnp.float32),
            "Wffn1_h": w((H, 2 * H)), "bffn1_h": b((2 * H,)),
            "Wffn2_h": w((2 * H, H)), "bffn2_h": b((H,)),
            "Wffn1_e": w((H, 2 * H)), "bffn1_e": b((2 * H,)),
            "Wffn2_e": w((2 * H, H)), "bffn2_e": b((H,)),
            "ln2_h_g": jnp.ones((H,), jnp.float32), "ln2_h_b": jnp.zeros((H,), jnp.float32),
            "ln2_e_g": jnp.ones((H,), jnp.float32), "ln2_e_b": jnp.zeros((H,), jnp.float32),
        }
        params["layers"].append(lp)

    params.update({
        "mlp_W0": w((OUT_DIM, OUT_DIM // 2)), "mlp_b0": b((OUT_DIM // 2,)),
        "mlp_W1": w((OUT_DIM // 2, OUT_DIM // 4)), "mlp_b1": b((OUT_DIM // 4,)),
        "mlp_W2": w((OUT_DIM // 4, N_CLASS)), "mlp_b2": b((N_CLASS,)),
    })
    return params


# ----------------------- main -----------------------
if __name__ == "__main__":
    key = jax.random.PRNGKey(0)
    k1, k2, k3, k4 = jax.random.split(key, 4)

    # Graph represented densely: node token ids, dense edge-type matrix, adjacency mask.
    h_idx = jax.random.randint(k1, (N_NODES,), 0, NUM_VOCAB, dtype=jnp.int32)
    e_idx = jax.random.randint(k2, (N_NODES, N_NODES), 0, NUM_EDGE_TYPE, dtype=jnp.int32)
    adj = (jax.random.uniform(k3, (N_NODES, N_NODES)) < 0.5).astype(jnp.float32)
    mask = jnp.maximum(adj, jnp.eye(N_NODES, dtype=jnp.float32))     # ensure self-loops
    lap_pos = jax.random.normal(k4, (N_NODES, POS_ENC_DIM), dtype=jnp.float32)

    params = init_params(jax.random.PRNGKey(1))

    # TODO(synk): DGL multi-graph batching / dgl.mean_nodes over segments is modeled
    # as a single dense graph (dense e values for non-edges never reach h because of
    # the mask); wl_pos_enc branch (disabled in config) not built.
    out = jax.jit(forward)(params, h_idx, e_idx, mask, lap_pos)
    out = jax.block_until_ready(out)
    assert out.shape == (1, N_CLASS)
    assert bool(jnp.all(jnp.isfinite(out)))
    print("KERNEL_OK")
</pallas_src>

<mosaic_0001>
module attributes {stable_mosaic.version = 11 : i64} {
  func.func @_forward_kernel(%arg0: memref<8x32xf32, #tpu.memory_space<vmem>>, %arg1: memref<8x8xf32, #tpu.memory_space<vmem>>, %arg2: memref<64x32xf32, #tpu.memory_space<vmem>>, %arg3: memref<64x1xf32, #tpu.memory_space<vmem>>, %arg4: memref<64x8xf32, #tpu.memory_space<vmem>>, %arg5: memref<64x8xf32, #tpu.memory_space<vmem>>, %arg6: memref<8x64xf32, #tpu.memory_space<vmem>>, %arg7: memref<8x32xf32, #tpu.memory_space<vmem>>, %arg8: memref<1x32xf32, #tpu.memory_space<vmem>>, %arg9: memref<32x32xf32, #tpu.memory_space<vmem>>, %arg10: memref<2x32x96xf32, #tpu.memory_space<vmem>>, %arg11: memref<2x32x32xf32, #tpu.memory_space<vmem>>, %arg12: memref<2x32x32xf32, #tpu.memory_space<vmem>>, %arg13: memref<2x1x32xf32, #tpu.memory_space<vmem>>, %arg14: memref<2x32x32xf32, #tpu.memory_space<vmem>>, %arg15: memref<2x1x32xf32, #tpu.memory_space<vmem>>, %arg16: memref<2x1x32xf32, #tpu.memory_space<vmem>>, %arg17: memref<2x1x32xf32, #tpu.memory_space<vmem>>, %arg18: memref<2x1x32xf32, #tpu.memory_space<vmem>>, %arg19: memref<2x1x32xf32, #tpu.memory_space<vmem>>, %arg20: memref<2x32x64xf32, #tpu.memory_space<vmem>>, %arg21: memref<2x1x64xf32, #tpu.memory_space<vmem>>, %arg22: memref<2x64x32xf32, #tpu.memory_space<vmem>>, %arg23: memref<2x1x32xf32, #tpu.memory_space<vmem>>, %arg24: memref<2x32x64xf32, #tpu.memory_space<vmem>>, %arg25: memref<2x1x64xf32, #tpu.memory_space<vmem>>, %arg26: memref<2x64x32xf32, #tpu.memory_space<vmem>>, %arg27: memref<2x1x32xf32, #tpu.memory_space<vmem>>, %arg28: memref<2x1x32xf32, #tpu.memory_space<vmem>>, %arg29: memref<2x1x32xf32, #tpu.memory_space<vmem>>, %arg30: memref<2x1x32xf32, #tpu.memory_space<vmem>>, %arg31: memref<2x1x32xf32, #tpu.memory_space<vmem>>, %arg32: memref<32x16xf32, #tpu.memory_space<vmem>>, %arg33: memref<1x16xf32, #tpu.memory_space<vmem>>, %arg34: memref<16x8xf32, #tpu.memory_space<vmem>>, %arg35: memref<1x8xf32, #tpu.memory_space<vmem>>, %arg36: memref<8x3xf32, #tpu.memory_space<vmem>>, %arg37: memref<1x3xf32, #tpu.memory_space<vmem>>, %arg38: memref<1x3xf32, #tpu.memory_space<vmem>>) attributes {dimension_semantics = [], scalar_prefetch = 0 : i64, scratch_operands = 0 : i64, tpu.core_type = #tpu.core_type<tc>} {
    %c0 = arith.constant 0 : index
    %c0_0 = arith.constant 0 : index
    %0 = vector.load %arg0[%c0, %c0_0] : memref<8x32xf32, #tpu.memory_space<vmem>>, vector<8x32xf32>
    %c0_1 = arith.constant 0 : index
    %c0_2 = arith.constant 0 : index
    %1 = vector.load %arg1[%c0_1, %c0_2] : memref<8x8xf32, #tpu.memory_space<vmem>>, vector<8x8xf32>
    %c0_3 = arith.constant 0 : index
    %c0_4 = arith.constant 0 : index
    %2 = vector.load %arg7[%c0_3, %c0_4] : memref<8x32xf32, #tpu.memory_space<vmem>>, vector<8x32xf32>
    %cst = arith.constant dense<0.000000e+00> : vector<8x32xf32>
    %3 = tpu.matmul %1, %2, %cst {dimension_numbers = #tpu.dot_dimension_numbers<[1], [0], [0], [1], [0, 0, 1, 1], [], []>} : vector<8x8xf32>, vector<8x32xf32>, vector<8x32xf32> -> vector<8x32xf32>
    %4 = arith.addf %0, %3 : vector<8x32xf32>
    %c0_5 = arith.constant 0 : index
    %c0_6 = arith.constant 0 : index
    %5 = vector.load %arg8[%c0_5, %c0_6] : memref<1x32xf32, #tpu.memory_space<vmem>>, vector<1x32xf32>
    %6 = vector.broadcast %5 : vector<1x32xf32> to vector<8x32xf32>
    %7 = arith.addf %4, %6 : vector<8x32xf32>
    %c0_7 = arith.constant 0 : index
    %c0_8 = arith.constant 0 : index
    %8 = vector.load %arg2[%c0_7, %c0_8] : memref<64x32xf32, #tpu.memory_space<vmem>>, vector<64x32xf32>
    %c0_9 = arith.constant 0 : index
    %c0_10 = arith.constant 0 : index
    %9 = vector.load %arg3[%c0_9, %c0_10] : memref<64x1xf32, #tpu.memory_space<vmem>>, vector<64x1xf32>
    %c0_11 = arith.constant 0 : index
    %c0_12 = arith.constant 0 : index
    %10 = vector.load %arg4[%c0_11, %c0_12] : memref<64x8xf32, #tpu.memory_space<vmem>>, vector<64x8xf32>
    %c0_13 = arith.constant 0 : index
    %c0_14 = arith.constant 0 : index
    %11 = vector.load %arg5[%c0_13, %c0_14] : memref<64x8xf32, #tpu.memory_space<vmem>>, vector<64x8xf32>
    %c0_15 = arith.constant 0 : index
    %c0_16 = arith.constant 0 : index
    %12 = vector.load %arg6[%c0_15, %c0_16] : memref<8x64xf32, #tpu.memory_space<vmem>>, vector<8x64xf32>
    %c0_17 = arith.constant 0 : index
    %c0_18 = arith.constant 0 : index
    %13 = vector.load %arg9[%c0_17, %c0_18] : memref<32x32xf32, #tpu.memory_space<vmem>>, vector<32x32xf32>
    %c0_19 = arith.constant 0 : index
    %c0_20 = arith.constant 0 : index
    %c0_21 = arith.constant 0 : index
    %14 = vector.load %arg10[%c0_19, %c0_20, %c0_21] : memref<2x32x96xf32, #tpu.memory_space<vmem>>, vector<1x32x96xf32>
    %15 = vector.shape_cast %14 : vector<1x32x96xf32> to vector<32x96xf32>
    %cst_22 = arith.constant dense<0.000000e+00> : vector<8x96xf32>
    %16 = tpu.matmul %7, %15, %cst_22 {dimension_numbers = #tpu.dot_dimension_numbers<[1], [0], [0], [1], [0, 0, 1, 1], [], []>} : vector<8x32xf32>, vector<32x96xf32>, vector<8x96xf32> -> vector<8x96xf32>
    %17 = vector.extract_strided_slice %16 {offsets = [0, 0], sizes = [8, 32], strides = [1, 1]} : vector<8x96xf32> to vector<8x32xf32>
    %18 = vector.extract_strided_slice %16 {offsets = [0, 32], sizes = [8, 32], strides = [1, 1]} : vector<8x96xf32> to vector<8x32xf32>
    %19 = vector.extract_strided_slice %16 {offsets = [0, 64], sizes = [8, 32], strides = [1, 1]} : vector<8x96xf32> to vector<8x32xf32>
    %c0_23 = arith.constant 0 : index
    %c0_24 = arith.constant 0 : index
    %c0_25 = arith.constant 0 : index
    %20 = vector.load %arg11[%c0_23, %c0_24, %c0_25] : memref<2x32x32xf32, #tpu.memory_space<vmem>>, vector<1x32x32xf32>
    %21 = vector.shape_cast %20 : vector<1x32x32xf32> to vector<32x32xf32>
    %cst_26 = arith.constant dense<0.000000e+00> : vector<64x32xf32>
    %22 = tpu.matmul %8, %21, %cst_26 {dimension_numbers = #tpu.dot_dimension_numbers<[1], [0], [0], [1], [0, 0, 1, 1], [], []>} : vector<64x32xf32>, vector<32x32xf32>, vector<64x32xf32> -> vector<64x32xf32>
    %cst_27 = arith.constant dense<0.000000e+00> : vector<64x32xf32>
    %23 = tpu.matmul %10, %17, %cst_27 {dimension_numbers = #tpu.dot_dimension_numbers<[1], [0], [0], [1], [0, 0, 1, 1], [], []>} : vector<64x8xf32>, vector<8x32xf32>, vector<64x32xf32> -> vector<64x32xf32>
    %cst_28 = arith.constant dense<0.000000e+00> : vector<64x32xf32>
    %24 = tpu.matmul %11, %18, %cst_28 {dimension_numbers = #tpu.dot_dimension_numbers<[1], [0], [0], [1], [0, 0, 1, 1], [], []>} : vector<64x8xf32>, vector<8x32xf32>, vector<64x32xf32> -> vector<64x32xf32>
    %cst_29 = arith.constant dense<0.000000e+00> : vector<64x32xf32>
    %25 = tpu.matmul %11, %19, %cst_29 {dimension_numbers = #tpu.dot_dimension_numbers<[1], [0], [0], [1], [0, 0, 1, 1], [], []>} : vector<64x8xf32>, vector<8x32xf32>, vector<64x32xf32> -> vector<64x32xf32>
    %26 = arith.mulf %23, %24 : vector<64x32xf32>
    %cst_30 = arith.constant 0.353553385 : f32
    %27 = vector.broadcast %cst_30 : f32 to vector<64x32xf32>
    %28 = arith.mulf %26, %27 : vector<64x32xf32>
    %29 = arith.mulf %28, %22 : vector<64x32xf32>
    %cst_31 = arith.constant dense<0.000000e+00> : vector<64x32xf32>
    %30 = tpu.matmul %29, %13, %cst_31 {dimension_numbers = #tpu.dot_dimension_numbers<[1], [0], [0], [1], [0, 0, 1, 1], [], []>} : vector<64x32xf32>, vector<32x32xf32>, vector<64x32xf32> -> vector<64x32xf32>
    %cst_32 = arith.constant -5.000000e+00 : f32
    %cst_33 = arith.constant 5.000000e+00 : f32
    %31 = vector.broadcast %cst_32 : f32 to vector<64x32xf32>
    %32 = arith.maximumf %31, %30 : vector<64x32xf32>
    %33 = vector.broadcast %cst_33 : f32 to vector<64x32xf32>
    %34 = arith.minimumf %33, %32 : vector<64x32xf32>
    %35 = math.exp %34 : vector<64x32xf32>
    %36 = vector.broadcast %9 : vector<64x1xf32> to vector<64x32xf32>
    %37 = arith.mulf %35, %36 : vector<64x32xf32>
    %38 = arith.mulf %37, %25 : vector<64x32xf32>
    %cst_34 = arith.constant dense<0.000000e+00> : vector<8x32xf32>
    %39 = tpu.matmul %12, %38, %cst_34 {dimension_numbers = #tpu.dot_dimension_numbers<[1], [0], [0], [1], [0, 0, 1, 1], [], []>} : vector<8x64xf32>, vector<64x32xf32>, vector<8x32xf32> -> vector<8x32xf32>
    %cst_35 = arith.constant dense<0.000000e+00> : vector<8x32xf32>
    %40 = tpu.matmul %12, %37, %cst_35 {dimension_numbers = #tpu.dot_dimension_numbers<[1], [0], [0], [1], [0, 0, 1, 1], [], []>} : vector<8x64xf32>, vector<64x32xf32>, vector<8x32xf32> -> vector<8x32xf32>
    %cst_36 = arith.constant 9.99999997E-7 : f32
    %41 = vector.broadcast %cst_36 : f32 to vector<8x32xf32>
    %42 = arith.addf %40, %41 : vector<8x32xf32>
    %43 = tpu.reciprocal %42 {approx = true} : vector<8x32xf32> -> vector<8x32xf32>
    %44 = arith.mulf %39, %43 : vector<8x32xf32>
    %c0_37 = arith.constant 0 : index
    %c0_38 = arith.constant 0 : index
    %c0_39 = arith.constant 0 : index
    %45 = vector.load %arg12[%c0_37, %c0_38, %c0_39] : memref<2x32x32xf32, #tpu.memory_space<vmem>>, vector<1x32x32xf32>
    %46 = vector.shape_cast %45 : vector<1x32x32xf32> to vector<32x32xf32>
    %cst_40 = arith.constant dense<0.000000e+00> : vector<8x32xf32>
    %47 = tpu.matmul %44, %46, %cst_40 {dimension_numbers = #tpu.dot_dimension_numbers<[1], [0], [0], [1], [0, 0, 1, 1], [], []>} : vector<8x32xf32>, vector<32x32xf32>, vector<8x32xf32> -> vector<8x32xf32>
    %c0_41 = arith.constant 0 : index
    %c0_42 = arith.constant 0 : index
    %c0_43 = arith.constant 0 : index
    %48 = vector.load %arg13[%c0_41, %c0_42, %c0_43] : memref<2x1x32xf32, #tpu.memory_space<vmem>>, vector<1x1x32xf32>
    %49 = vector.shape_cast %48 : vector<1x1x32xf32> to vector<1x32xf32>
    %50 = vector.broadcast %49 : vector<1x32xf32> to vector<8x32xf32>
    %51 = arith.addf %47, %50 : vector<8x32xf32>
    %c0_44 = arith.constant 0 : index
    %c0_45 = arith.constant 0 : index
    %c0_46 = arith.constant 0 : index
    %52 = vector.load %arg14[%c0_44, %c0_45, %c0_46] : memref<2x32x32xf32, #tpu.memory_space<vmem>>, vector<1x32x32xf32>
    %53 = vector.shape_cast %52 : vector<1x32x32xf32> to vector<32x32xf32>
    %cst_47 = arith.constant dense<0.000000e+00> : vector<64x32xf32>
    %54 = tpu.matmul %29, %53, %cst_47 {dimension_numbers = #tpu.dot_dimension_numbers<[1], [0], [0], [1], [0, 0, 1, 1], [], []>} : vector<64x32xf32>, vector<32x32xf32>, vector<64x32xf32> -> vector<64x32xf32>
    %c0_48 = arith.constant 0 : index
    %c0_49 = arith.constant 0 : index
    %c0_50 = arith.constant 0 : index
    %55 = vector.load %arg15[%c0_48, %c0_49, %c0_50] : memref<2x1x32xf32, #tpu.memory_space<vmem>>, vector<1x1x32xf32>
    %56 = vector.shape_cast %55 : vector<1x1x32xf32> to vector<1x32xf32>
    %57 = vector.broadcast %56 : vector<1x32xf32> to vector<64x32xf32>
    %58 = arith.addf %54, %57 : vector<64x32xf32>
    %59 = arith.addf %7, %51 : vector<8x32xf32>
    %c0_51 = arith.constant 0 : index
    %c0_52 = arith.constant 0 : index
    %c0_53 = arith.constant 0 : index
    %60 = vector.load %arg16[%c0_51, %c0_52, %c0_53] : memref<2x1x32xf32, #tpu.memory_space<vmem>>, vector<1x1x32xf32>
    %61 = vector.shape_cast %60 : vector<1x1x32xf32> to vector<1x32xf32>
    %c0_54 = arith.constant 0 : index
    %c0_55 = arith.constant 0 : index
    %c0_56 = arith.constant 0 : index
    %62 = vector.load %arg17[%c0_54, %c0_55, %c0_56] : memref<2x1x32xf32, #tpu.memory_space<vmem>>, vector<1x1x32xf32>
    %63 = vector.shape_cast %62 : vector<1x1x32xf32> to vector<1x32xf32>
    %cst_57 = arith.constant dense<0.000000e+00> : vector<8xf32>
    %64 = vector.multi_reduction <add>, %59, %cst_57 [1] : vector<8x32xf32> to vector<8xf32>
    %65 = vector.shape_cast %64 : vector<8xf32> to vector<8x1xf32>
    %cst_58 = arith.constant 3.200000e+01 : f32
    %66 = vector.broadcast %cst_58 : f32 to vector<8x1xf32>
    %67 = arith.divf %65, %66 : vector<8x1xf32>
    %68 = vector.broadcast %67 : vector<8x1xf32> to vector<8x32xf32>
    %69 = arith.subf %59, %68 : vector<8x32xf32>
    %70 = vector.broadcast %67 : vector<8x1xf32> to vector<8x32xf32>
    %71 = arith.subf %59, %70 : vector<8x32xf32>
    %72 = arith.mulf %69, %71 : vector<8x32xf32>
    %cst_59 = arith.constant dense<0.000000e+00> : vector<8xf32>
    %73 = vector.multi_reduction <add>, %72, %cst_59 [1] : vector<8x32xf32> to vector<8xf32>
    %74 = vector.shape_cast %73 : vector<8xf32> to vector<8x1xf32>
    %cst_60 = arith.constant 3.200000e+01 : f32
    %75 = vector.broadcast %cst_60 : f32 to vector<8x1xf32>
    %76 = arith.divf %74, %75 : vector<8x1xf32>
    %77 = vector.broadcast %67 : vector<8x1xf32> to vector<8x32xf32>
    %78 = arith.subf %59, %77 : vector<8x32xf32>
    %cst_61 = arith.constant 9.99999974E-6 : f32
    %79 = vector.broadcast %cst_61 : f32 to vector<8x1xf32>
    %80 = arith.addf %76, %79 : vector<8x1xf32>
    %81 = math.rsqrt %80 : vector<8x1xf32>
    %82 = vector.broadcast %81 : vector<8x1xf32> to vector<8x32xf32>
    %83 = arith.mulf %78, %82 : vector<8x32xf32>
    %84 = vector.broadcast %61 : vector<1x32xf32> to vector<8x32xf32>
    %85 = arith.mulf %83, %84 : vector<8x32xf32>
    %86 = vector.broadcast %63 : vector<1x32xf32> to vector<8x32xf32>
    %87 = arith.addf %85, %86 : vector<8x32xf32>
    %88 = arith.addf %8, %58 : vector<64x32xf32>
    %c0_62 = arith.constant 0 : index
    %c0_63 = arith.constant 0 : index
    %c0_64 = arith.constant 0 : index
    %89 = vector.load %arg18[%c0_62, %c0_63, %c0_64] : memref<2x1x32xf32, #tpu.memory_space<vmem>>, vector<1x1x32xf32>
    %90 = vector.shape_cast %89 : vector<1x1x32xf32> to vector<1x32xf32>
    %c0_65 = arith.constant 0 : index
    %c0_66 = arith.constant 0 : index
    %c0_67 = arith.constant 0 : index
    %91 = vector.load %arg19[%c0_65, %c0_66, %c0_67] : memref<2x1x32xf32, #tpu.memory_space<vmem>>, vector<1x1x32xf32>
    %92 = vector.shape_cast %91 : vector<1x1x32xf32> to vector<1x32xf32>
    %cst_68 = arith.constant dense<0.000000e+00> : vector<64xf32>
    %93 = vector.multi_reduction <add>, %88, %cst_68 [1] : vector<64x32xf32> to vector<64xf32>
    %94 = vector.shape_cast %93 : vector<64xf32> to vector<64x1xf32>
    %cst_69 = arith.constant 3.200000e+01 : f32
    %95 = vector.broadcast %cst_69 : f32 to vector<64x1xf32>
    %96 = arith.divf %94, %95 : vector<64x1xf32>
    %97 = vector.broadcast %96 : vector<64x1xf32> to vector<64x32xf32>
    %98 = arith.subf %88, %97 : vector<64x32xf32>
    %99 = vector.broadcast %96 : vector<64x1xf32> to vector<64x32xf32>
    %100 = arith.subf %88, %99 : vector<64x32xf32>
    %101 = arith.mulf %98, %100 : vector<64x32xf32>
    %cst_70 = arith.constant dense<0.000000e+00> : vector<64xf32>
    %102 = vector.multi_reduction <add>, %101, %cst_70 [1] : vector<64x32xf32> to vector<64xf32>
    %103 = vector.shape_cast %102 : vector<64xf32> to vector<64x1xf32>
    %cst_71 = arith.constant 3.200000e+01 : f32
    %104 = vector.broadcast %cst_71 : f32 to vector<64x1xf32>
    %105 = arith.divf %103, %104 : vector<64x1xf32>
    %106 = vector.broadcast %96 : vector<64x1xf32> to vector<64x32xf32>
    %107 = arith.subf %88, %106 : vector<64x32xf32>
    %cst_72 = arith.constant 9.99999974E-6 : f32
    %108 = vector.broadcast %cst_72 : f32 to vector<64x1xf32>
    %109 = arith.addf %105, %108 : vector<64x1xf32>
    %110 = math.rsqrt %109 : vector<64x1xf32>
    %111 = vector.broadcast %110 : vector<64x1xf32> to vector<64x32xf32>
    %112 = arith.mulf %107, %111 : vector<64x32xf32>
    %113 = vector.broadcast %90 : vector<1x32xf32> to vector<64x32xf32>
    %114 = arith.mulf %112, %113 : vector<64x32xf32>
    %115 = vector.broadcast %92 : vector<1x32xf32> to vector<64x32xf32>
    %116 = arith.addf %114, %115 : vector<64x32xf32>
    %c0_73 = arith.constant 0 : index
    %c0_74 = arith.constant 0 : index
    %c0_75 = arith.constant 0 : index
    %117 = vector.load %arg20[%c0_73, %c0_74, %c0_75] : memref<2x32x64xf32, #tpu.memory_space<vmem>>, vector<1x32x64xf32>
    %118 = vector.shape_cast %117 : vector<1x32x64xf32> to vector<32x64xf32>
    %cst_76 = arith.constant dense<0.000000e+00> : vector<8x64xf32>
    %119 = tpu.matmul %87, %118, %cst_76 {dimension_numbers = #tpu.dot_dimension_numbers<[1], [0], [0], [1], [0, 0, 1, 1], [], []>} : vector<8x32xf32>, vector<32x64xf32>, vector<8x64xf32> -> vector<8x64xf32>
    %c0_77 = arith.constant 0 : index
    %c0_78 = arith.constant 0 : index
    %c0_79 = arith.constant 0 : index
    %120 = vector.load %arg21[%c0_77, %c0_78, %c0_79] : memref<2x1x64xf32, #tpu.memory_space<vmem>>, vector<1x1x64xf32>
    %121 = vector.shape_cast %120 : vector<1x1x64xf32> to vector<1x64xf32>
    %122 = vector.broadcast %121 : vector<1x64xf32> to vector<8x64xf32>
    %123 = arith.addf %119, %122 : vector<8x64xf32>
    %cst_80 = arith.constant 0.000000e+00 : f32
    %124 = vector.broadcast %cst_80 : f32 to vector<8x64xf32>
    %125 = arith.maximumf %123, %124 : vector<8x64xf32>
    %c0_81 = arith.constant 0 : index
    %c0_82 = arith.constant 0 : index
    %c0_83 = arith.constant 0 : index
    %126 = vector.load %arg22[%c0_81, %c0_82, %c0_83] : memref<2x64x32xf32, #tpu.memory_space<vmem>>, vector<1x64x32xf32>
    %127 = vector.shape_cast %126 : vector<1x64x32xf32> to vector<64x32xf32>
    %cst_84 = arith.constant dense<0.000000e+00> : vector<8x32xf32>
    %128 = tpu.matmul %125, %127, %cst_84 {dimension_numbers = #tpu.dot_dimension_numbers<[1], [0], [0], [1], [0, 0, 1, 1], [], []>} : vector<8x64xf32>, vector<64x32xf32>, vector<8x32xf32> -> vector<8x32xf32>
    %c0_85 = arith.constant 0 : index
    %c0_86 = arith.constant 0 : index
    %c0_87 = arith.constant 0 : index
    %129 = vector.load %arg23[%c0_85, %c0_86, %c0_87] : memref<2x1x32xf32, #tpu.memory_space<vmem>>, vector<1x1x32xf32>
    %130 = vector.shape_cast %129 : vector<1x1x32xf32> to vector<1x32xf32>
    %131 = vector.broadcast %130 : vector<1x32xf32> to vector<8x32xf32>
    %132 = arith.addf %128, %131 : vector<8x32xf32>
    %c0_88 = arith.constant 0 : index
    %c0_89 = arith.constant 0 : index
    %c0_90 = arith.constant 0 : index
    %133 = vector.load %arg24[%c0_88, %c0_89, %c0_90] : memref<2x32x64xf32, #tpu.memory_space<vmem>>, vector<1x32x64xf32>
    %134 = vector.shape_cast %133 : vector<1x32x64xf32> to vector<32x64xf32>
    %cst_91 = arith.constant dense<0.000000e+00> : vector<64x64xf32>
    %135 = tpu.matmul %116, %134, %cst_91 {dimension_numbers = #tpu.dot_dimension_numbers<[1], [0], [0], [1], [0, 0, 1, 1], [], []>} : vector<64x32xf32>, vector<32x64xf32>, vector<64x64xf32> -> vector<64x64xf32>
    %c0_92 = arith.constant 0 : index
    %c0_93 = arith.constant 0 : index
    %c0_94 = arith.constant 0 : index
    %136 = vector.load %arg25[%c0_92, %c0_93, %c0_94] : memref<2x1x64xf32, #tpu.memory_space<vmem>>, vector<1x1x64xf32>
    %137 = vector.shape_cast %136 : vector<1x1x64xf32> to vector<1x64xf32>
    %138 = vector.broadcast %137 : vector<1x64xf32> to vector<64x64xf32>
    %139 = arith.addf %135, %138 : vector<64x64xf32>
    %cst_95 = arith.constant 0.000000e+00 : f32
    %140 = vector.broadcast %cst_95 : f32 to vector<64x64xf32>
    %141 = arith.maximumf %139, %140 : vector<64x64xf32>
    %c0_96 = arith.constant 0 : index
    %c0_97 = arith.constant 0 : index
    %c0_98 = arith.constant 0 : index
    %142 = vector.load %arg26[%c0_96, %c0_97, %c0_98] : memref<2x64x32xf32, #tpu.memory_space<vmem>>, vector<1x64x32xf32>
    %143 = vector.shape_cast %142 : vector<1x64x32xf32> to vector<64x32xf32>
    %cst_99 = arith.constant dense<0.000000e+00> : vector<64x32xf32>
    %144 = tpu.matmul %141, %143, %cst_99 {dimension_numbers = #tpu.dot_dimension_numbers<[1], [0], [0], [1], [0, 0, 1, 1], [], []>} : vector<64x64xf32>, vector<64x32xf32>, vector<64x32xf32> -> vector<64x32xf32>
    %c0_100 = arith.constant 0 : index
    %c0_101 = arith.constant 0 : index
    %c0_102 = arith.constant 0 : index
    %145 = vector.load %arg27[%c0_100, %c0_101, %c0_102] : memref<2x1x32xf32, #tpu.memory_space<vmem>>, vector<1x1x32xf32>
    %146 = vector.shape_cast %145 : vector<1x1x32xf32> to vector<1x32xf32>
    %147 = vector.broadcast %146 : vector<1x32xf32> to vector<64x32xf32>
    %148 = arith.addf %144, %147 : vector<64x32xf32>
    %149 = arith.addf %87, %132 : vector<8x32xf32>
    %c0_103 = arith.constant 0 : index
    %c0_104 = arith.constant 0 : index
    %c0_105 = arith.constant 0 : index
    %150 = vector.load %arg28[%c0_103, %c0_104, %c0_105] : memref<2x1x32xf32, #tpu.memory_space<vmem>>, vector<1x1x32xf32>
    %151 = vector.shape_cast %150 : vector<1x1x32xf32> to vector<1x32xf32>
    %c0_106 = arith.constant 0 : index
    %c0_107 = arith.constant 0 : index
    %c0_108 = arith.constant 0 : index
    %152 = vector.load %arg29[%c0_106, %c0_107, %c0_108] : memref<2x1x32xf32, #tpu.memory_space<vmem>>, vector<1x1x32xf32>
    %153 = vector.shape_cast %152 : vector<1x1x32xf32> to vector<1x32xf32>
    %cst_109 = arith.constant dense<0.000000e+00> : vector<8xf32>
    %154 = vector.multi_reduction <add>, %149, %cst_109 [1] : vector<8x32xf32> to vector<8xf32>
    %155 = vector.shape_cast %154 : vector<8xf32> to vector<8x1xf32>
    %cst_110 = arith.constant 3.200000e+01 : f32
    %156 = vector.broadcast %cst_110 : f32 to vector<8x1xf32>
    %157 = arith.divf %155, %156 : vector<8x1xf32>
    %158 = vector.broadcast %157 : vector<8x1xf32> to vector<8x32xf32>
    %159 = arith.subf %149, %158 : vector<8x32xf32>
    %160 = vector.broadcast %157 : vector<8x1xf32> to vector<8x32xf32>
    %161 = arith.subf %149, %160 : vector<8x32xf32>
    %162 = arith.mulf %159, %161 : vector<8x32xf32>
    %cst_111 = arith.constant dense<0.000000e+00> : vector<8xf32>
    %163 = vector.multi_reduction <add>, %162, %cst_111 [1] : vector<8x32xf32> to vector<8xf32>
    %164 = vector.shape_cast %163 : vector<8xf32> to vector<8x1xf32>
    %cst_112 = arith.constant 3.200000e+01 : f32
    %165 = vector.broadcast %cst_112 : f32 to vector<8x1xf32>
    %166 = arith.divf %164, %165 : vector<8x1xf32>
    %167 = vector.broadcast %157 : vector<8x1xf32> to vector<8x32xf32>
    %168 = arith.subf %149, %167 : vector<8x32xf32>
    %cst_113 = arith.constant 9.99999974E-6 : f32
    %169 = vector.broadcast %cst_113 : f32 to vector<8x1xf32>
    %170 = arith.addf %166, %169 : vector<8x1xf32>
    %171 = math.rsqrt %170 : vector<8x1xf32>
    %172 = vector.broadcast %171 : vector<8x1xf32> to vector<8x32xf32>
    %173 = arith.mulf %168, %172 : vector<8x32xf32>
    %174 = vector.broadcast %151 : vector<1x32xf32> to vector<8x32xf32>
    %175 = arith.mulf %173, %174 : vector<8x32xf32>
    %176 = vector.broadcast %153 : vector<1x32xf32> to vector<8x32xf32>
    %177 = arith.addf %175, %176 : vector<8x32xf32>
    %178 = arith.addf %116, %148 : vector<64x32xf32>
    %c0_114 = arith.constant 0 : index
    %c0_115 = arith.constant 0 : index
    %c0_116 = arith.constant 0 : index
    %179 = vector.load %arg30[%c0_114, %c0_115, %c0_116] : memref<2x1x32xf32, #tpu.memory_space<vmem>>, vector<1x1x32xf32>
    %180 = vector.shape_cast %179 : vector<1x1x32xf32> to vector<1x32xf32>
    %c0_117 = arith.constant 0 : index
    %c0_118 = arith.constant 0 : index
    %c0_119 = arith.constant 0 : index
    %181 = vector.load %arg31[%c0_117, %c0_118, %c0_119] : memref<2x1x32xf32, #tpu.memory_space<vmem>>, vector<1x1x32xf32>
    %182 = vector.shape_cast %181 : vector<1x1x32xf32> to vector<1x32xf32>
    %cst_120 = arith.constant dense<0.000000e+00> : vector<64xf32>
    %183 = vector.multi_reduction <add>, %178, %cst_120 [1] : vector<64x32xf32> to vector<64xf32>
    %184 = vector.shape_cast %183 : vector<64xf32> to vector<64x1xf32>
    %cst_121 = arith.constant 3.200000e+01 : f32
    %185 = vector.broadcast %cst_121 : f32 to vector<64x1xf32>
    %186 = arith.divf %184, %185 : vector<64x1xf32>
    %187 = vector.broadcast %186 : vector<64x1xf32> to vector<64x32xf32>
    %188 = arith.subf %178, %187 : vector<64x32xf32>
    %189 = vector.broadcast %186 : vector<64x1xf32> to vector<64x32xf32>
    %190 = arith.subf %178, %189 : vector<64x32xf32>
    %191 = arith.mulf %188, %190 : vector<64x32xf32>
    %cst_122 = arith.constant dense<0.000000e+00> : vector<64xf32>
    %192 = vector.multi_reduction <add>, %191, %cst_122 [1] : vector<64x32xf32> to vector<64xf32>
    %193 = vector.shape_cast %192 : vector<64xf32> to vector<64x1xf32>
    %cst_123 = arith.constant 3.200000e+01 : f32
    %194 = vector.broadcast %cst_123 : f32 to vector<64x1xf32>
    %195 = arith.divf %193, %194 : vector<64x1xf32>
    %196 = vector.broadcast %186 : vector<64x1xf32> to vector<64x32xf32>
    %197 = arith.subf %178, %196 : vector<64x32xf32>
    %cst_124 = arith.constant 9.99999974E-6 : f32
    %198 = vector.broadcast %cst_124 : f32 to vector<64x1xf32>
    %199 = arith.addf %195, %198 : vector<64x1xf32>
    %200 = math.rsqrt %199 : vector<64x1xf32>
    %201 = vector.broadcast %200 : vector<64x1xf32> to vector<64x32xf32>
    %202 = arith.mulf %197, %201 : vector<64x32xf32>
    %203 = vector.broadcast %180 : vector<1x32xf32> to vector<64x32xf32>
    %204 = arith.mulf %202, %203 : vector<64x32xf32>
    %205 = vector.broadcast %182 : vector<1x32xf32> to vector<64x32xf32>
    %206 = arith.addf %204, %205 : vector<64x32xf32>
    %c1 = arith.constant 1 : index
    %c0_125 = arith.constant 0 : index
    %c0_126 = arith.constant 0 : index
    %207 = vector.load %arg10[%c1, %c0_125, %c0_126] : memref<2x32x96xf32, #tpu.memory_space<vmem>>, vector<1x32x96xf32>
    %208 = vector.shape_cast %207 : vector<1x32x96xf32> to vector<32x96xf32>
    %cst_127 = arith.constant dense<0.000000e+00> : vector<8x96xf32>
    %209 = tpu.matmul %177, %208, %cst_127 {dimension_numbers = #tpu.dot_dimension_numbers<[1], [0], [0], [1], [0, 0, 1, 1], [], []>} : vector<8x32xf32>, vector<32x96xf32>, vector<8x96xf32> -> vector<8x96xf32>
    %210 = vector.extract_strided_slice %209 {offsets = [0, 0], sizes = [8, 32], strides = [1, 1]} : vector<8x96xf32> to vector<8x32xf32>
    %211 = vector.extract_strided_slice %209 {offsets = [0, 32], sizes = [8, 32], strides = [1, 1]} : vector<8x96xf32> to vector<8x32xf32>
    %212 = vector.extract_strided_slice %209 {offsets = [0, 64], sizes = [8, 32], strides = [1, 1]} : vector<8x96xf32> to vector<8x32xf32>
    %c1_128 = arith.constant 1 : index
    %c0_129 = arith.constant 0 : index
    %c0_130 = arith.constant 0 : index
    %213 = vector.load %arg11[%c1_128, %c0_129, %c0_130] : memref<2x32x32xf32, #tpu.memory_space<vmem>>, vector<1x32x32xf32>
    %214 = vector.shape_cast %213 : vector<1x32x32xf32> to vector<32x32xf32>
    %cst_131 = arith.constant dense<0.000000e+00> : vector<64x32xf32>
    %215 = tpu.matmul %206, %214, %cst_131 {dimension_numbers = #tpu.dot_dimension_numbers<[1], [0], [0], [1], [0, 0, 1, 1], [], []>} : vector<64x32xf32>, vector<32x32xf32>, vector<64x32xf32> -> vector<64x32xf32>
    %cst_132 = arith.constant dense<0.000000e+00> : vector<64x32xf32>
    %216 = tpu.matmul %10, %210, %cst_132 {dimension_numbers = #tpu.dot_dimension_numbers<[1], [0], [0], [1], [0, 0, 1, 1], [], []>} : vector<64x8xf32>, vector<8x32xf32>, vector<64x32xf32> -> vector<64x32xf32>
    %cst_133 = arith.constant dense<0.000000e+00> : vector<64x32xf32>
    %217 = tpu.matmul %11, %211, %cst_133 {dimension_numbers = #tpu.dot_dimension_numbers<[1], [0], [0], [1], [0, 0, 1, 1], [], []>} : vector<64x8xf32>, vector<8x32xf32>, vector<64x32xf32> -> vector<64x32xf32>
    %cst_134 = arith.constant dense<0.000000e+00> : vector<64x32xf32>
    %218 = tpu.matmul %11, %212, %cst_134 {dimension_numbers = #tpu.dot_dimension_numbers<[1], [0], [0], [1], [0, 0, 1, 1], [], []>} : vector<64x8xf32>, vector<8x32xf32>, vector<64x32xf32> -> vector<64x32xf32>
    %219 = arith.mulf %216, %217 : vector<64x32xf32>
    %cst_135 = arith.constant 0.353553385 : f32
    %220 = vector.broadcast %cst_135 : f32 to vector<64x32xf32>
    %221 = arith.mulf %219, %220 : vector<64x32xf32>
    %222 = arith.mulf %221, %215 : vector<64x32xf32>
    %cst_136 = arith.constant dense<0.000000e+00> : vector<64x32xf32>
    %223 = tpu.matmul %222, %13, %cst_136 {dimension_numbers = #tpu.dot_dimension_numbers<[1], [0], [0], [1], [0, 0, 1, 1], [], []>} : vector<64x32xf32>, vector<32x32xf32>, vector<64x32xf32> -> vector<64x32xf32>
    %cst_137 = arith.constant -5.000000e+00 : f32
    %cst_138 = arith.constant 5.000000e+00 : f32
    %224 = vector.broadcast %cst_137 : f32 to vector<64x32xf32>
    %225 = arith.maximumf %224, %223 : vector<64x32xf32>
    %226 = vector.broadcast %cst_138 : f32 to vector<64x32xf32>
    %227 = arith.minimumf %226, %225 : vector<64x32xf32>
    %228 = math.exp %227 : vector<64x32xf32>
    %229 = vector.broadcast %9 : vector<64x1xf32> to vector<64x32xf32>
    %230 = arith.mulf %228, %229 : vector<64x32xf32>
    %231 = arith.mulf %230, %218 : vector<64x32xf32>
    %cst_139 = arith.constant dense<0.000000e+00> : vector<8x32xf32>
    %232 = tpu.matmul %12, %231, %cst_139 {dimension_numbers = #tpu.dot_dimension_numbers<[1], [0], [0], [1], [0, 0, 1, 1], [], []>} : vector<8x64xf32>, vector<64x32xf32>, vector<8x32xf32> -> vector<8x32xf32>
    %cst_140 = arith.constant dense<0.000000e+00> : vector<8x32xf32>
    %233 = tpu.matmul %12, %230, %cst_140 {dimension_numbers = #tpu.dot_dimension_numbers<[1], [0], [0], [1], [0, 0, 1, 1], [], []>} : vector<8x64xf32>, vector<64x32xf32>, vector<8x32xf32> -> vector<8x32xf32>
    %cst_141 = arith.constant 9.99999997E-7 : f32
    %234 = vector.broadcast %cst_141 : f32 to vector<8x32xf32>
    %235 = arith.addf %233, %234 : vector<8x32xf32>
    %236 = tpu.reciprocal %235 {approx = true} : vector<8x32xf32> -> vector<8x32xf32>
    %237 = arith.mulf %232, %236 : vector<8x32xf32>
    %c1_142 = arith.constant 1 : index
    %c0_143 = arith.constant 0 : index
    %c0_144 = arith.constant 0 : index
    %238 = vector.load %arg12[%c1_142, %c0_143, %c0_144] : memref<2x32x32xf32, #tpu.memory_space<vmem>>, vector<1x32x32xf32>
    %239 = vector.shape_cast %238 : vector<1x32x32xf32> to vector<32x32xf32>
    %cst_145 = arith.constant dense<0.000000e+00> : vector<8x32xf32>
    %240 = tpu.matmul %237, %239, %cst_145 {dimension_numbers = #tpu.dot_dimension_numbers<[1], [0], [0], [1], [0, 0, 1, 1], [], []>} : vector<8x32xf32>, vector<32x32xf32>, vector<8x32xf32> -> vector<8x32xf32>
    %c1_146 = arith.constant 1 : index
    %c0_147 = arith.constant 0 : index
    %c0_148 = arith.constant 0 : index
    %241 = vector.load %arg13[%c1_146, %c0_147, %c0_148] : memref<2x1x32xf32, #tpu.memory_space<vmem>>, vector<1x1x32xf32>
    %242 = vector.shape_cast %241 : vector<1x1x32xf32> to vector<1x32xf32>
    %243 = vector.broadcast %242 : vector<1x32xf32> to vector<8x32xf32>
    %244 = arith.addf %240, %243 : vector<8x32xf32>
    %245 = arith.addf %177, %244 : vector<8x32xf32>
    %c1_149 = arith.constant 1 : index
    %c0_150 = arith.constant 0 : index
    %c0_151 = arith.constant 0 : index
    %246 = vector.load %arg16[%c1_149, %c0_150, %c0_151] : memref<2x1x32xf32, #tpu.memory_space<vmem>>, vector<1x1x32xf32>
    %247 = vector.shape_cast %246 : vector<1x1x32xf32> to vector<1x32xf32>
    %c1_152 = arith.constant 1 : index
    %c0_153 = arith.constant 0 : index
    %c0_154 = arith.constant 0 : index
    %248 = vector.load %arg17[%c1_152, %c0_153, %c0_154] : memref<2x1x32xf32, #tpu.memory_space<vmem>>, vector<1x1x32xf32>
    %249 = vector.shape_cast %248 : vector<1x1x32xf32> to vector<1x32xf32>
    %cst_155 = arith.constant dense<0.000000e+00> : vector<8xf32>
    %250 = vector.multi_reduction <add>, %245, %cst_155 [1] : vector<8x32xf32> to vector<8xf32>
    %251 = vector.shape_cast %250 : vector<8xf32> to vector<8x1xf32>
    %cst_156 = arith.constant 3.200000e+01 : f32
    %252 = vector.broadcast %cst_156 : f32 to vector<8x1xf32>
    %253 = arith.divf %251, %252 : vector<8x1xf32>
    %254 = vector.broadcast %253 : vector<8x1xf32> to vector<8x32xf32>
    %255 = arith.subf %245, %254 : vector<8x32xf32>
    %256 = vector.broadcast %253 : vector<8x1xf32> to vector<8x32xf32>
    %257 = arith.subf %245, %256 : vector<8x32xf32>
    %258 = arith.mulf %255, %257 : vector<8x32xf32>
    %cst_157 = arith.constant dense<0.000000e+00> : vector<8xf32>
    %259 = vector.multi_reduction <add>, %258, %cst_157 [1] : vector<8x32xf32> to vector<8xf32>
    %260 = vector.shape_cast %259 : vector<8xf32> to vector<8x1xf32>
    %cst_158 = arith.constant 3.200000e+01 : f32
    %261 = vector.broadcast %cst_158 : f32 to vector<8x1xf32>
    %262 = arith.divf %260, %261 : vector<8x1xf32>
    %263 = vector.broadcast %253 : vector<8x1xf32> to vector<8x32xf32>
    %264 = arith.subf %245, %263 : vector<8x32xf32>
    %cst_159 = arith.constant 9.99999974E-6 : f32
    %265 = vector.broadcast %cst_159 : f32 to vector<8x1xf32>
    %266 = arith.addf %262, %265 : vector<8x1xf32>
    %267 = math.rsqrt %266 : vector<8x1xf32>
    %268 = vector.broadcast %267 : vector<8x1xf32> to vector<8x32xf32>
    %269 = arith.mulf %264, %268 : vector<8x32xf32>
    %270 = vector.broadcast %247 : vector<1x32xf32> to vector<8x32xf32>
    %271 = arith.mulf %269, %270 : vector<8x32xf32>
    %272 = vector.broadcast %249 : vector<1x32xf32> to vector<8x32xf32>
    %273 = arith.addf %271, %272 : vector<8x32xf32>
    %c1_160 = arith.constant 1 : index
    %c0_161 = arith.constant 0 : index
    %c0_162 = arith.constant 0 : index
    %274 = vector.load %arg20[%c1_160, %c0_161, %c0_162] : memref<2x32x64xf32, #tpu.memory_space<vmem>>, vector<1x32x64xf32>
    %275 = vector.shape_cast %274 : vector<1x32x64xf32> to vector<32x64xf32>
    %cst_163 = arith.constant dense<0.000000e+00> : vector<8x64xf32>
    %276 = tpu.matmul %273, %275, %cst_163 {dimension_numbers = #tpu.dot_dimension_numbers<[1], [0], [0], [1], [0, 0, 1, 1], [], []>} : vector<8x32xf32>, vector<32x64xf32>, vector<8x64xf32> -> vector<8x64xf32>
    %c1_164 = arith.constant 1 : index
    %c0_165 = arith.constant 0 : index
    %c0_166 = arith.constant 0 : index
    %277 = vector.load %arg21[%c1_164, %c0_165, %c0_166] : memref<2x1x64xf32, #tpu.memory_space<vmem>>, vector<1x1x64xf32>
    %278 = vector.shape_cast %277 : vector<1x1x64xf32> to vector<1x64xf32>
    %279 = vector.broadcast %278 : vector<1x64xf32> to vector<8x64xf32>
    %280 = arith.addf %276, %279 : vector<8x64xf32>
    %cst_167 = arith.constant 0.000000e+00 : f32
    %281 = vector.broadcast %cst_167 : f32 to vector<8x64xf32>
    %282 = arith.maximumf %280, %281 : vector<8x64xf32>
    %c1_168 = arith.constant 1 : index
    %c0_169 = arith.constant 0 : index
    %c0_170 = arith.constant 0 : index
    %283 = vector.load %arg22[%c1_168, %c0_169, %c0_170] : memref<2x64x32xf32, #tpu.memory_space<vmem>>, vector<1x64x32xf32>
    %284 = vector.shape_cast %283 : vector<1x64x32xf32> to vector<64x32xf32>
    %cst_171 = arith.constant dense<0.000000e+00> : vector<8x32xf32>
    %285 = tpu.matmul %282, %284, %cst_171 {dimension_numbers = #tpu.dot_dimension_numbers<[1], [0], [0], [1], [0, 0, 1, 1], [], []>} : vector<8x64xf32>, vector<64x32xf32>, vector<8x32xf32> -> vector<8x32xf32>
    %c1_172 = arith.constant 1 : index
    %c0_173 = arith.constant 0 : index
    %c0_174 = arith.constant 0 : index
    %286 = vector.load %arg23[%c1_172, %c0_173, %c0_174] : memref<2x1x32xf32, #tpu.memory_space<vmem>>, vector<1x1x32xf32>
    %287 = vector.shape_cast %286 : vector<1x1x32xf32> to vector<1x32xf32>
    %288 = vector.broadcast %287 : vector<1x32xf32> to vector<8x32xf32>
    %289 = arith.addf %285, %288 : vector<8x32xf32>
    %290 = arith.addf %273, %289 : vector<8x32xf32>
    %c1_175 = arith.constant 1 : index
    %c0_176 = arith.constant 0 : index
    %c0_177 = arith.constant 0 : index
    %291 = vector.load %arg28[%c1_175, %c0_176, %c0_177] : memref<2x1x32xf32, #tpu.memory_space<vmem>>, vector<1x1x32xf32>
    %292 = vector.shape_cast %291 : vector<1x1x32xf32> to vector<1x32xf32>
    %c1_178 = arith.constant 1 : index
    %c0_179 = arith.constant 0 : index
    %c0_180 = arith.constant 0 : index
    %293 = vector.load %arg29[%c1_178, %c0_179, %c0_180] : memref<2x1x32xf32, #tpu.memory_space<vmem>>, vector<1x1x32xf32>
    %294 = vector.shape_cast %293 : vector<1x1x32xf32> to vector<1x32xf32>
    %cst_181 = arith.constant dense<0.000000e+00> : vector<8xf32>
    %295 = vector.multi_reduction <add>, %290, %cst_181 [1] : vector<8x32xf32> to vector<8xf32>
    %296 = vector.shape_cast %295 : vector<8xf32> to vector<8x1xf32>
    %cst_182 = arith.constant 3.200000e+01 : f32
    %297 = vector.broadcast %cst_182 : f32 to vector<8x1xf32>
    %298 = arith.divf %296, %297 : vector<8x1xf32>
    %299 = vector.broadcast %298 : vector<8x1xf32> to vector<8x32xf32>
    %300 = arith.subf %290, %299 : vector<8x32xf32>
    %301 = vector.broadcast %298 : vector<8x1xf32> to vector<8x32xf32>
    %302 = arith.subf %290, %301 : vector<8x32xf32>
    %303 = arith.mulf %300, %302 : vector<8x32xf32>
    %cst_183 = arith.constant dense<0.000000e+00> : vector<8xf32>
    %304 = vector.multi_reduction <add>, %303, %cst_183 [1] : vector<8x32xf32> to vector<8xf32>
    %305 = vector.shape_cast %304 : vector<8xf32> to vector<8x1xf32>
    %cst_184 = arith.constant 3.200000e+01 : f32
    %306 = vector.broadcast %cst_184 : f32 to vector<8x1xf32>
    %307 = arith.divf %305, %306 : vector<8x1xf32>
    %308 = vector.broadcast %298 : vector<8x1xf32> to vector<8x32xf32>
    %309 = arith.subf %290, %308 : vector<8x32xf32>
    %cst_185 = arith.constant 9.99999974E-6 : f32
    %310 = vector.broadcast %cst_185 : f32 to vector<8x1xf32>
    %311 = arith.addf %307, %310 : vector<8x1xf32>
    %312 = math.rsqrt %311 : vector<8x1xf32>
    %313 = vector.broadcast %312 : vector<8x1xf32> to vector<8x32xf32>
    %314 = arith.mulf %309, %313 : vector<8x32xf32>
    %315 = vector.broadcast %292 : vector<1x32xf32> to vector<8x32xf32>
    %316 = arith.mulf %314, %315 : vector<8x32xf32>
    %317 = vector.broadcast %294 : vector<1x32xf32> to vector<8x32xf32>
    %318 = arith.addf %316, %317 : vector<8x32xf32>
    %cst_186 = arith.constant dense<0.000000e+00> : vector<32xf32>
    %319 = vector.multi_reduction <add>, %318, %cst_186 [0] : vector<8x32xf32> to vector<32xf32>
    %320 = vector.shape_cast %319 : vector<32xf32> to vector<1x32xf32>
    %cst_187 = arith.constant 8.000000e+00 : f32
    %321 = vector.broadcast %cst_187 : f32 to vector<1x32xf32>
    %322 = arith.divf %320, %321 : vector<1x32xf32>
    %c0_188 = arith.constant 0 : index
    %c0_189 = arith.constant 0 : index
    %323 = vector.load %arg32[%c0_188, %c0_189] : memref<32x16xf32, #tpu.memory_space<vmem>>, vector<32x16xf32>
    %cst_190 = arith.constant dense<0.000000e+00> : vector<1x16xf32>
    %324 = tpu.matmul %322, %323, %cst_190 {dimension_numbers = #tpu.dot_dimension_numbers<[1], [0], [0], [1], [0, 0, 1, 1], [], []>} : vector<1x32xf32>, vector<32x16xf32>, vector<1x16xf32> -> vector<1x16xf32>
    %c0_191 = arith.constant 0 : index
    %c0_192 = arith.constant 0 : index
    %325 = vector.load %arg33[%c0_191, %c0_192] : memref<1x16xf32, #tpu.memory_space<vmem>>, vector<1x16xf32>
    %326 = arith.addf %324, %325 : vector<1x16xf32>
    %cst_193 = arith.constant 0.000000e+00 : f32
    %327 = vector.broadcast %cst_193 : f32 to vector<1x16xf32>
    %328 = arith.maximumf %326, %327 : vector<1x16xf32>
    %c0_194 = arith.constant 0 : index
    %c0_195 = arith.constant 0 : index
    %329 = vector.load %arg34[%c0_194, %c0_195] : memref<16x8xf32, #tpu.memory_space<vmem>>, vector<16x8xf32>
    %cst_196 = arith.constant dense<0.000000e+00> : vector<1x8xf32>
    %330 = tpu.matmul %328, %329, %cst_196 {dimension_numbers = #tpu.dot_dimension_numbers<[1], [0], [0], [1], [0, 0, 1, 1], [], []>} : vector<1x16xf32>, vector<16x8xf32>, vector<1x8xf32> -> vector<1x8xf32>
    %c0_197 = arith.constant 0 : index
    %c0_198 = arith.constant 0 : index
    %331 = vector.load %arg35[%c0_197, %c0_198] : memref<1x8xf32, #tpu.memory_space<vmem>>, vector<1x8xf32>
    %332 = arith.addf %330, %331 : vector<1x8xf32>
    %cst_199 = arith.constant 0.000000e+00 : f32
    %333 = vector.broadcast %cst_199 : f32 to vector<1x8xf32>
    %334 = arith.maximumf %332, %333 : vector<1x8xf32>
    %c0_200 = arith.constant 0 : index
    %c0_201 = arith.constant 0 : index
    %335 = vector.load %arg36[%c0_200, %c0_201] : memref<8x3xf32, #tpu.memory_space<vmem>>, vector<8x3xf32>
    %cst_202 = arith.constant dense<0.000000e+00> : vector<1x3xf32>
    %336 = tpu.matmul %334, %335, %cst_202 {dimension_numbers = #tpu.dot_dimension_numbers<[1], [0], [0], [1], [0, 0, 1, 1], [], []>} : vector<1x8xf32>, vector<8x3xf32>, vector<1x3xf32> -> vector<1x3xf32>
    %c0_203 = arith.constant 0 : index
    %c0_204 = arith.constant 0 : index
    %337 = vector.load %arg37[%c0_203, %c0_204] : memref<1x3xf32, #tpu.memory_space<vmem>>, vector<1x3xf32>
    %338 = arith.addf %336, %337 : vector<1x3xf32>
    %c0_205 = arith.constant 0 : index
    %c0_206 = arith.constant 0 : index
    %339 = vector.load %arg38[%c0_205, %c0_206] : memref<1x3xf32, #tpu.memory_space<vmem>>, vector<1x3xf32>
    tpu.vector_store %arg38[%c0_205, %c0_206], %338 {strides = array<i32>} : memref<1x3xf32, #tpu.memory_space<vmem>>, vector<1x3xf32>,
    return
  }
}

</mosaic_0001>

<bundles_post_ra>
// kernel: forward.1
= control target key start
LH: loop header
LB: loop body
LE: loop exit
PB: predicated region body
PF: predicated region fallthrough
CT: control target
= control target key end

     0   :  { %s2619_s6 = smov 1   ;;  %s2620_s10 = smov 2   ;;  %s3600_s0 = inlined_call_operand.smem [shape: u32[39], index: -1, kind: input, shape index: {}] }
   0x1   :  { %s2671_s5 = sld [smem:[%s3600_s0]]   ;;  %s2621_s14 = smov 3  }
   0x2   :  { %s2676_s9 = sld [smem:[%s3600_s0 + %s2619_s6]]   ;;  %s2622_s18 = smov 4  }
   0x3   :  { %s2681_s13 = sld [smem:[%s3600_s0 + %s2620_s10]]   ;;  %s2623_s22 = smov 5  }
   0x4   :  { %s2686_s17 = sld [smem:[%s3600_s0 + %s2621_s14]]   ;;  %s2624_s26 = smov 6  }
   0x5   :  { %s2691_s21 = sld [smem:[%s3600_s0 + %s2622_s18]]   ;;  %s2625_s30 = smov 7  }
   0x6   :  { %s2696_s25 = sld [smem:[%s3600_s0 + %s2623_s22]]   ;;  %s2626_s4 = smov 8  }
   0x7   :  { %s2701_s29 = sld [smem:[%s3600_s0 + %s2624_s26]]   ;;  %s2627_s10 = smov 9  }
   0x8   :  { %s2706_s3 = sld [smem:[%s3600_s0 + %s2625_s30]]   ;;  %s2628_s15 = smov 10  }
   0x9   :  { %s2711_s8 = sld [smem:[%s3600_s0 + %s2626_s4]]   ;;  %s2629_s20 = smov 11  }
   0xa   :  { %s2716_s14 = sld [smem:[%s3600_s0 + %s2627_s10]]   ;;  %s2630_s26 = smov 12  }
   0xb   :  { %s2721_s19 = sld [smem:[%s3600_s0 + %s2628_s15]]   ;;  %s2631_s1 = smov 13  }
   0xc   :  { %s2726_s24 = sld [smem:[%s3600_s0 + %s2629_s20]]   ;;  %s2632_s7 = smov 14  }
   0xd   :  { %s2731_s30 = sld [smem:[%s3600_s0 + %s2630_s26]]   ;;  %s2633_s15 = smov 15  }
   0xe   :  { %s2736_s6 = sld [smem:[%s3600_s0 + %s2631_s1]]   ;;  %s2634_s22 = smov 16  }
   0xf   :  { %s2741_s12 = sld [smem:[%s3600_s0 + %s2632_s7]]   ;;  %s2635_s28 = smov 17  }
  0x10   :  { %s2746_s20 = sld [smem:[%s3600_s0 + %s2633_s15]]   ;;  %s2636_s7 = smov 18  }
  0x11   :  { %s2751_s27 = sld [smem:[%s3600_s0 + %s2634_s22]]   ;;  %s2637_s15 = smov 19  }
  0x12   :  { %s2756_s4 = sld [smem:[%s3600_s0 + %s2635_s28]]   ;;  %s2638_s22 = smov 20  }
  0x13   :  { %s2639_s28 = smov 21  }
  0x14   :  { %3614 = sst [smem:[#allocation5_spill]] %s2736_s6 }
  0x15   :  { %s2761_s6 = sld [smem:[%s3600_s0 + %s2636_s7]]   ;;  %s2640_s7 = smov 22  }
  0x16   :  { %3615 = sst [smem:[#allocation6_spill]] %s2746_s20 }
  0x17   :  { %3616 = sst [smem:[#allocation7_spill]] %s2751_s27 }
  0x18   :  { %3617 = sst [smem:[#allocation8_spill]] %s2756_s4 }
  0x19   :  { %s2766_s20 = sld [smem:[%s3600_s0 + %s2637_s15]]   ;;  %s2641_s15 = smov 23  }
  0x1a   :  { %s2771_s27 = sld [smem:[%s3600_s0 + %s2638_s22]]   ;;  %s2642_s22 = smov 24  }
  0x1b   :  { %3618 = sst [smem:[#allocation9_spill]] %s2761_s6 }
  0x1c   :  { %s2776_s4 = sld [smem:[%s3600_s0 + %s2639_s28]]   ;;  %s2643_s28 = smov 25  }
  0x1d   :  { %s2781_s6 = sld [smem:[%s3600_s0 + %s2640_s7]]   ;;  %s2644_s7 = smov 26  }
  0x1f   :  { %3619 = sst [smem:[#allocation10_spill]] %s2766_s20 }
  0x20   :  { %3620 = sst [smem:[#allocation11_spill]] %s2771_s27 }
  0x21   :  { %s2786_s20 = sld [smem:[%s3600_s0 + %s2641_s15]]   ;;  %s2645_s15 = smov 27  }
  0x22   :  { %3621 = sst [smem:[#allocation12_spill]] %s2776_s4 }
  0x23   :  { %3622 = sst [smem:[#allocation13_spill]] %s2781_s6 }
  0x24   :  { %s2791_s27 = sld [smem:[%s3600_s0 + %s2642_s22]]   ;;  %s2646_s22 = smov 28  }
  0x25   :  { %s2796_s4 = sld [smem:[%s3600_s0 + %s2643_s28]]   ;;  %s2647_s28 = smov 29  }
  0x26   :  { %s2801_s6 = sld [smem:[%s3600_s0 + %s2644_s7]]   ;;  %s2648_s7 = smov 30  }
  0x27   :  { %3623 = sst [smem:[#allocation14_spill]] %s2786_s20 }
  0x28   :  { %s2806_s20 = sld [smem:[%s3600_s0 + %s2645_s15]]   ;;  %s2649_s15 = smov 31  }
  0x2a   :  { %3624 = sst [smem:[#allocation15_spill]] %s2791_s27 }
  0x2b   :  { %3625 = sst [smem:[#allocation16_spill]] %s2796_s4 }
  0x2c   :  { %3626 = sst [smem:[#allocation17_spill]] %s2801_s6 }
  0x2d   :  { %s2811_s27 = sld [smem:[%s3600_s0 + %s2646_s22]]   ;;  %s2650_s22 = smov 32  }
  0x2e   :  { %3627 = sst [smem:[#allocation18_spill]] %s2806_s20 }
  0x2f   :  { %s2816_s4 = sld [smem:[%s3600_s0 + %s2647_s28]]   ;;  %s2651_s28 = smov 33  }
  0x30   :  { %s2821_s6 = sld [smem:[%s3600_s0 + %s2648_s7]]   ;;  %s2652_s7 = smov 34  }
  0x31   :  { %s2826_s20 = sld [smem:[%s3600_s0 + %s2649_s15]]   ;;  %s2653_s15 = smov 35  }
  0x33   :  { %3628 = sst [smem:[#allocation19_spill]] %s2811_s27 }
  0x34   :  { %s2831_s27 = sld [smem:[%s3600_s0 + %s2650_s22]]   ;;  %s2654_s22 = smov 36  }
  0x35   :  { %3629 = sst [smem:[#allocation20_spill]] %s2816_s4 }
  0x36   :  { %3630 = sst [smem:[#allocation21_spill]] %s2821_s6 }
  0x37   :  { %3631 = sst [smem:[#allocation22_spill]] %s2826_s20 }
  0x38   :  { %s2836_s4 = sld [smem:[%s3600_s0 + %s2651_s28]]   ;;  %s2655_s28 = smov 37  }
  0x39   :  { %s2841_s6 = sld [smem:[%s3600_s0 + %s2652_s7]]   ;;  %s2656_s7 = smov 38  }
  0x3a   :  { %3632 = sst [smem:[#allocation23_spill]] %s2831_s27 }
  0x3b   :  { %s2846_s20 = sld [smem:[%s3600_s0 + %s2653_s15]]  }
  0x3c   :  { %s2851_s27 = sld [smem:[%s3600_s0 + %s2654_s22]]  }
  0x3e   :  { %3633 = sst [smem:[#allocation24_spill]] %s2836_s4 }
  0x3f   :  { %3634 = sst [smem:[#allocation25_spill]] %s2841_s6 }
  0x40   :  { %s2856_s4 = sld [smem:[%s3600_s0 + %s2655_s28]]  }
  0x41   :  { %s2861_s6 = sld [smem:[%s3600_s0 + %s2656_s7]]  }
  0x42   :  { %v161_v0 = vld [vmem:[%s2706_s3] sm:$0xff]  ;;  %vm162_vm0 = vcmask 64512   ;;  %v232_v2 = vld [vmem:[%s2721_s19 + $0x18] sm:$0xff] }
  0x43   :  { %v160_v1 = vld [vmem:[%s2676_s9] sm:$0xff]  ;;  %181 = vmatpush.msra.mxu0 %v161_v0  ;;  %249 = vmatpush.msra.mxu1 %v232_v2 }
  0x44   :  { %2255 = vmatmul.msk.f32.vlgmr.msra.gmra.mxu0 %vm162_vm0, %v160_v1 }
  0x45   :  { %82 = vsyncpa [#allocation3], 0  ;;  %v231_v3 = vld [vmem:[%s2721_s19 + $0x10] sm:$0xff]  ;;  %v230_v4 = vld [vmem:[%s2721_s19 + $0x8] sm:$0xff]  ;;  %vm233_vm1 = vcmask 261120   ;;  %s2657_s0 = smov 96  }
  0x46   :  { %250 = vmatpush.msra.mxu1 %v231_v3  ;;  %v229_v5 = vld [vmem:[%s2721_s19] sm:$0xff]  ;;  %v260_v11 = vld [vmem:[%s2726_s24 + $0x18] sm:$0xff]  ;;  %v259_v12 = vld [vmem:[%s2726_s24 + $0x10] sm:$0xff]  ;;  %v2659_v46 = vmov 0   ;;  %vm681_vm2 = vcmask 523264   ;;  %s3635_s9 = sld [smem:[#allocation6_spill]] }
  0x47   :  { %v159_v6 = vld [vmem:[%s2671_s5] sm:$0xff]  ;;  %297 = vmatpush.msra.mxu2 %v260_v11  ;;  %v258_v13 = vld [vmem:[%s2726_s24 + $0x8] sm:$0xff]  ;;  %s2658_s5 = smov 64   ;;  %v210_v20 = vld [vmem:[%s2691_s21 + $0x10] sm:$0xff]  ;;  %2467 = vset.pattern.permute.xlu1 %v2659_v46  ;;  %s3638_s3 = sld [smem:[#allocation15_spill]] }
  0x48   :  { %251 = vmatpush.msra.mxu1 %v230_v4  ;;  %v2470_v7 = vld [vmem:[%s2711_s8] ss:$0 sm:$0xff]  ;;  %v209_v18 = vld [vmem:[%s2691_s21 + $0x8] sm:$0xff]  ;;  %v2898_v21 = vld [vmem:[%s2681_s13 + $0x10] sm:$0xff]  ;;  %2468 = vset.pattern.permute.xlu2 %v2659_v46  ;;  %s3639_s8 = sld [smem:[#allocation7_spill]]  ;;  %s2208_s10 = sshll.u32 %s2861_s6, 4  ;;  %s2209_s10 = int_to_ptr.hbm [resolvable:$true] %s2208_s10 }
  0x49   :  { %298 = vmatpush.msra.mxu2 %v259_v12  ;;  %v257_v14 = vld [vmem:[%s2726_s24] sm:$0xff]  ;;  %v2891_v19 = vld [vmem:[%s2681_s13 + $0x8] sm:$0xff]  ;;  %v211_v22 = vld [vmem:[%s2691_s21 + $0x18] sm:$0xff]  ;;  %2469 = vset.pattern.permute.xlu0 %v2659_v46  ;;  %s3641_s15 = sld [smem:[#allocation9_spill]]  ;;  %s2609_s11 = scalar_lea.hbm %s2861_s6, 1 }
  0x4a   :  { %252 = vmatpush.msra.mxu1 %v229_v5  ;;  %v2881_v15 = vld [vmem:[%s2681_s13] sm:$0xff]  ;;  %v2905_v23 = vld [vmem:[%s2681_s13 + $0x18] sm:$0xff]  ;;  %v213_v28 = vld [vmem:[%s2691_s21 + $0x28] sm:$0xff]  ;;  %s3642_s16 = sld [smem:[#allocation10_spill]] }
  0x4b   :  { %299 = vmatpush.msra.mxu2 %v258_v13  ;;  %v208_v16 = vld [vmem:[%s2691_s21] sm:$0xff]  ;;  %v2921_v29 = vld [vmem:[%s2681_s13 + $0x28] sm:$0xff]  ;;  %v214_v32 = vld [vmem:[%s2691_s21 + $0x30] sm:$0xff]  ;;  %s3643_s18 = sld [smem:[#allocation13_spill]] }
  0x4c   :  { %v212_v24 = vld [vmem:[%s2691_s21 + $0x20] sm:$0xff]  ;;  %v217_v30 = vld [vmem:[%s2696_s25 + $0x8] sm:$0xff]  ;;  %v2930_v33 = vld [vmem:[%s2681_s13 + $0x30] sm:$0xff]  ;;  %s3644_s22 = sld [smem:[#allocation17_spill]] }
  0x4d   :  { %300 = vmatpush.msra.mxu2 %v257_v14  ;;  %v2912_v25 = vld [vmem:[%s2681_s13 + $0x20] sm:$0xff]  ;;  %v218_v34 = vld [vmem:[%s2696_s25 + $0x10] sm:$0xff]  ;;  %v215_v35 = vld [vmem:[%s2691_s21 + $0x38] sm:$0xff]  ;;  %s3645_s23 = sld [smem:[#allocation12_spill]] }
  0x4e   :  { %2257 = vmatmul.msk.f32.vlgmr.msra.gmra.mxu2 %vm233_vm1, %v2881_v15  ;;  %v216_v26 = vld [vmem:[%s2696_s25] sm:$0xff]  ;;  %v2940_v36 = vld [vmem:[%s2681_s13 + $0x38] sm:$0xff]  ;;  %v221_v39 = vld [vmem:[%s2696_s25 + $0x28] sm:$0xff]  ;;  %s3636_s13 = sld [smem:[#allocation5_spill]] }
  0x4f   :  { %v219_v37 = vld [vmem:[%s2696_s25 + $0x18] sm:$0xff]  ;;  %v220_v38 = vld [vmem:[%s2696_s25 + $0x20] sm:$0xff]  ;;  %v222_v40 = vld [vmem:[%s2696_s25 + $0x30] sm:$0xff]  ;;  %s3646_s26 = sld [smem:[#allocation16_spill]] }
  0x50   :  { %v223_v41 = vld [vmem:[%s2696_s25 + $0x38] sm:$0xff]  ;;  %v227_v43 = vld [vmem:[%s2716_s14 + $0x10] sm:$0xff]  ;;  %v226_v44 = vld [vmem:[%s2716_s14 + $0x8] sm:$0xff]  ;;  %s3647_s28 = sld [smem:[#allocation14_spill]] }
  0x51   :  { %v228_v42 = vld [vmem:[%s2716_s14 + $0x18] sm:$0xff]  ;;  %v225_v45 = vld [vmem:[%s2716_s14] sm:$0xff]  ;;  %v206_v48 = vld [vmem:[%s2686_s17 + $0x30] sm:$0xff]  ;;  %s3648_s1 = sld [smem:[#allocation18_spill]] }
  0x52   :  { %v207_v47 = vld [vmem:[%s2686_s17 + $0x38] sm:$0xff]  ;;  %v202_v52 = vld [vmem:[%s2686_s17 + $0x10] sm:$0xff]  ;;  %v200_v57 = vld [vmem:[%s2686_s17] sm:$0xff]  ;;  %s3652_s2 = sld [smem:[#allocation22_spill]] }
  0x53   :  { %662 = vperm.xlu1 %2467, %v207_v47   ;;  %v204_v13 = vld [vmem:[%s2686_s17 + $0x20] sm:$0xff]  ;;  %v203_v14 = vld [vmem:[%s2686_s17 + $0x18] sm:$0xff] }
  0x56   :  { %2258 = vmatmul.msk.f32.gmra.mxu2 %vm233_vm1, %v2891_v19 }
  0x5b   :  { %657 = vperm.xlu1 %2467, %v206_v48  }
  0x5e   :  { %2259 = vmatmul.msk.f32.gmra.mxu2 %vm233_vm1, %v2898_v21 }
  0x63   :  { %637 = vperm.xlu1 %2467, %v202_v52  }
  0x66   :  { %2260 = vmatmul.msk.f32.gmra.mxu2 %vm233_vm1, %v2905_v23 }
  0x6b   :  { %627 = vperm.xlu1 %2467, %v200_v57  }
  0x6e   :  { %2261 = vmatmul.msk.f32.gmra.mxu2 %vm233_vm1, %v2912_v25 }
  0x76   :  { %2262 = vmatmul.msk.f32.gmra.mxu2 %vm233_vm1, %v2921_v29 }
  0x7e   :  { %2263 = vmatmul.msk.f32.gmra.mxu2 %vm233_vm1, %v2930_v33 }
  0x86   :  { %2264 = vmatmul.msk.f32.gmra.mxu2 %vm233_vm1, %v2940_v36 }
  0xc1   :  { %v183_v8 = vpop.f32.mrf.mxu0 }
  0xc2   :  { %v186_v9 = vadd.f32 %v183_v8, %v159_v6  ;;  %v205_v6 = vld [vmem:[%s2686_s17 + $0x28] sm:$0xff] }
  0xc3   :  { %652 = vperm.xlu2 %2468, %v205_v6  }
  0xc4   :  { %v2872_v10 = vadd.f32 %v2470_v7, %v186_v9 }
  0xc6   :  { %2256 = vmatmul.msk.f32.vlgmr.msra.gmra.mxu1 %vm233_vm1, %v2872_v10 }
  0xcb   :  { %647 = vperm.xlu2 %2468, %v204_v13  }
  0xd1   :  { %v302_v49 = vpop.f32.mrf.mxu2 }
  0xd9   :  { %v305_v53 = vpop.f32.mrf.mxu2 }
  0xe1   :  { %v308_v61 = vpop.f32.mrf.mxu2 }
  0xe9   :  { %v311_v4 = vpop.f32.mrf.mxu2 }
 0x143   :  { %v254_v17 = vpop.f32.mrf.mxu1 }
 0x144   :  { %392 = vrot.lane.b32.xlu0 %v254_v17, %s2657_s0  ;;  %365 = vmatpush.msrb.mxu0 %v254_v17 }
 0x145   :  { %2422 = vmatpush.msra.mxu3 %v254_v17  ;;  %2265 = vmatmul.msk.f32.vlgmr.msrb.gmra.mxu0 %vm162_vm0, %v208_v16  ;;  %v314_v16 = vpop.f32.mrf.mxu2 }
 0x146   :  { %2266 = vmatmul.msk.f32.vlgmr.msra.gmra.mxu3 %vm162_vm0, %v209_v18 }
 0x147   :  { %564 = vmatpush.msrb.mxu3 %v228_v42 }
 0x149   :  { %565 = vmatpush.msrb.mxu3 %v227_v43 }
 0x14b   :  { %566 = vmatpush.msrb.mxu3 %v226_v44 }
 0x14c   :  { %460 = vrot.lane.b32.xlu0 %v254_v17, %s2658_s5 }
 0x14d   :  { %567 = vmatpush.msrb.mxu3 %v225_v45 }
 0x14e   :  { %2267 = vmatmul.msk.f32.gmra.mxu3 %vm162_vm0, %v210_v20 }
 0x154   :  { %642 = vperm.xlu0 %2469, %v203_v14  }
 0x156   :  { %2268 = vmatmul.msk.f32.gmra.mxu3 %vm162_vm0, %v211_v22  ;;  %v201_v22 = vld [vmem:[%s2686_s17 + $0x8] sm:$0xff]  ;;  %s3637_s17 = sld [smem:[#allocation11_spill]] }
 0x157   :  { %632 = vperm.xlu2 %2468, %v201_v22  }
 0x15e   :  { %2269 = vmatmul.msk.f32.gmra.mxu3 %vm162_vm0, %v212_v24 }
 0x166   :  { %2270 = vmatmul.msk.f32.gmra.mxu3 %vm162_vm0, %v213_v28  ;;  %v317_v28 = vpop.f32.mrf.mxu2 }
 0x16e   :  { %2271 = vmatmul.msk.f32.gmra.mxu3 %vm162_vm0, %v214_v32 }
 0x176   :  { %2272 = vmatmul.msk.f32.gmra.mxu3 %vm162_vm0, %v215_v35 }
 0x1b6   :  { %v393_v27 = vpop.permute.xlu0 %392 }
 0x1b7   :  { %434 = vmatpush.msra.mxu0 %v393_v27 }
 0x1b8   :  { %2273 = vmatmul.msk.f32.vlgmr.msra.gmra.mxu0 %vm162_vm0, %v216_v26 }
 0x1be   :  { %v461_v31 = vpop.permute.xlu0 %460 }
 0x1bf   :  { %478 = vmatpush.msrb.mxu1 %v461_v31 }
 0x1c0   :  { %2274 = vmatmul.msk.f32.gmra.mxu0 %vm162_vm0, %v217_v30  ;;  %2281 = vmatmul.msk.f32.vlgmr.msrb.gmra.mxu1 %vm162_vm0, %v216_v26 }
 0x1c2   :  { %v367_v50 = vpop.f32.mrf.mxu0 }
 0x1c8   :  { %2275 = vmatmul.msk.f32.gmra.mxu0 %vm162_vm0, %v218_v34  ;;  %2282 = vmatmul.msk.f32.gmra.mxu1 %vm162_vm0, %v217_v30 }
 0x1c9   :  { %v370_v51 = vpop.f32.mrf.mxu3 }
 0x1d0   :  { %2276 = vmatmul.msk.f32.gmra.mxu0 %vm162_vm0, %v219_v37  ;;  %2283 = vmatmul.msk.f32.gmra.mxu1 %vm162_vm0, %v218_v34 }
 0x1d1   :  { %v373_v58 = vpop.f32.mrf.mxu3 }
 0x1d8   :  { %2277 = vmatmul.msk.f32.gmra.mxu0 %vm162_vm0, %v220_v38  ;;  %2284 = vmatmul.msk.f32.gmra.mxu1 %vm162_vm0, %v219_v37 }
 0x1d9   :  { %v376_v1 = vpop.f32.mrf.mxu3 }
 0x1e0   :  { %2278 = vmatmul.msk.f32.gmra.mxu0 %vm162_vm0, %v221_v39  ;;  %2285 = vmatmul.msk.f32.gmra.mxu1 %vm162_vm0, %v220_v38  ;;  %v320_v38 = vpop.f32.mrf.mxu2 }
 0x1e1   :  { %v379_v9 = vpop.f32.mrf.mxu3 }
 0x1e8   :  { %2279 = vmatmul.msk.f32.gmra.mxu0 %vm162_vm0, %v222_v40  ;;  %2286 = vmatmul.msk.f32.gmra.mxu1 %vm162_vm0, %v221_v39  ;;  %v323_v45 = vpop.f32.mrf.mxu2 }
 0x1e9   :  { %v382_v24 = vpop.f32.mrf.mxu3 }
 0x1f0   :  { %2280 = vmatmul.msk.f32.gmra.mxu0 %vm162_vm0, %v223_v41  ;;  %2287 = vmatmul.msk.f32.gmra.mxu1 %vm162_vm0, %v222_v40 }
 0x1f1   :  { %v385_v34 = vpop.f32.mrf.mxu3 }
 0x1f8   :  { %2288 = vmatmul.msk.f32.gmra.mxu1 %vm162_vm0, %v223_v41 }
 0x1f9   :  { %v388_v42 = vpop.f32.mrf.mxu3 }
 0x235   :  { %v436_v54 = vpop.f32.mrf.mxu0 }
 0x236   :  { %v504_v55 = vmul.f32 %v436_v54, %v367_v50 }
 0x238   :  { %v512_v56 = vmul.f32 0.35355338, %v504_v55 }
 0x23a   :  { %v2970_v59 = vmul.f32 %v512_v56, %v302_v49 }
 0x23c   :  { %2289 = vmatmul.msk.f32.vlgmr.msrb.gmra.mxu3 %vm233_vm1, %v2970_v59 }
 0x23d   :  { %v439_v60 = vpop.f32.mrf.mxu0  ;;  %v3006_v48 = vpop.f32.mrf.mxu1 }
 0x23e   :  { %v505_v62 = vmul.f32 %v439_v60, %v370_v51  ;;  %v3014_v60 = vpop.permute.xlu1 %662 }
 0x240   :  { %v513_v63 = vmul.f32 0.35355338, %v505_v62 }
 0x242   :  { %v2974_v0 = vmul.f32 %v513_v63, %v305_v53 }
 0x244   :  { %2290 = vmatmul.msk.f32.gmra.mxu3 %vm233_vm1, %v2974_v0 }
 0x245   :  { %v442_v2 = vpop.f32.mrf.mxu0  ;;  %v3008_v50 = vpop.f32.mrf.mxu1 }
 0x246   :  { %v506_v3 = vmul.f32 %v442_v2, %v373_v58  ;;  %v3016_v2 = vpop.permute.xlu2 %652 }
 0x248   :  { %v514_v5 = vmul.f32 0.35355338, %v506_v3 }
 0x24a   :  { %v2979_v7 = vmul.f32 %v514_v5, %v308_v61 }
 0x24c   :  { %2291 = vmatmul.msk.f32.gmra.mxu3 %vm233_vm1, %v2979_v7 }
 0x24d   :  { %v445_v8 = vpop.f32.mrf.mxu0  ;;  %v3010_v53 = vpop.f32.mrf.mxu1 }
 0x24e   :  { %v507_v11 = vmul.f32 %v445_v8, %v376_v1  ;;  %v3018_v8 = vpop.permute.xlu1 %657 }
 0x250   :  { %v515_v12 = vmul.f32 0.35355338, %v507_v11 }
 0x252   :  { %v2985_v17 = vmul.f32 %v515_v12, %v311_v4 }
 0x254   :  { %2292 = vmatmul.msk.f32.gmra.mxu3 %vm233_vm1, %v2985_v17 }
 0x255   :  { %v448_v18 = vpop.f32.mrf.mxu0  ;;  %v3012_v55 = vpop.f32.mrf.mxu1 }
 0x256   :  { %v508_v20 = vmul.f32 %v448_v18, %v379_v9 }
 0x258   :  { %v516_v26 = vmul.f32 0.35355338, %v508_v20 }
 0x25a   :  { %v2990_v27 = vmul.f32 %v516_v26, %v314_v16 }
 0x25c   :  { %2293 = vmatmul.msk.f32.gmra.mxu3 %vm233_vm1, %v2990_v27 }
 0x25d   :  { %v451_v30 = vpop.f32.mrf.mxu0  ;;  %v492_v57 = vpop.f32.mrf.mxu1 }
 0x25e   :  { %v509_v31 = vmul.f32 %v451_v30, %v382_v24  ;;  %v3020_v30 = vpop.permute.xlu2 %647 }
 0x260   :  { %v517_v32 = vmul.f32 0.35355338, %v509_v31 }
 0x262   :  { %v2994_v35 = vmul.f32 %v517_v32, %v317_v28 }
 0x264   :  { %2294 = vmatmul.msk.f32.gmra.mxu3 %vm233_vm1, %v2994_v35 }
 0x265   :  { %v454_v37 = vpop.f32.mrf.mxu0  ;;  %v495_v61 = vpop.f32.mrf.mxu1 }
 0x266   :  { %v510_v39 = vmul.f32 %v454_v37, %v385_v34  ;;  %v3022_v37 = vpop.permute.xlu1 %637 }
 0x268   :  { %v518_v40 = vmul.f32 0.35355338, %v510_v39 }
 0x26a   :  { %v2998_v41 = vmul.f32 %v518_v40, %v320_v38 }
 0x26c   :  { %2295 = vmatmul.msk.f32.gmra.mxu3 %vm233_vm1, %v2998_v41 }
 0x26d   :  { %v457_v43 = vpop.f32.mrf.mxu0  ;;  %v498_v12 = vpop.f32.mrf.mxu1 }
 0x26e   :  { %v511_v44 = vmul.f32 %v457_v43, %v388_v42 }
 0x270   :  { %v519_v46 = vmul.f32 0.35355338, %v511_v44 }
 0x272   :  { %v3002_v47 = vmul.f32 %v519_v46, %v323_v45  ;;  %v3027_v46 = vpop.permute.xlu0 %642 }
 0x274   :  { %2296 = vmatmul.msk.f32.gmra.mxu3 %vm233_vm1, %v3002_v47 }
 0x275   :  { %v501_v38 = vpop.f32.mrf.mxu1 }
 0x2bf   :  { %v569_v49 = vpop.f32.mrf.mxu3 }
 0x2c0   :  { %v2297_v22 = vclamps-f32 %v569_v49, 5.0 }
 0x2c2   :  { %v609_v34 = vmul.f32 1.442695, %v2297_v22 }
 0x2c7   :  { %v572_v51 = vpop.f32.mrf.mxu3 }
 0x2c8   :  { %v2298_v18 = vclamps-f32 %v572_v51, 5.0 }
 0x2ca   :  { %v611_v28 = vmul.f32 1.442695, %v2298_v18 }
 0x2cf   :  { %v575_v52 = vpop.f32.mrf.mxu3 }
 0x2d0   :  { %v2299_v13 = vclamps-f32 %v575_v52, 5.0 }
 0x2d2   :  { %v613_v24 = vmul.f32 1.442695, %v2299_v13  ;;  %v760_v13 = vld [vmem:[%s2741_s12 + $0x10] sm:$0xff] }
 0x2d7   :  { %v578_v54 = vpop.f32.mrf.mxu3 }
 0x2d8   :  { %v2300_v9 = vclamps-f32 %v578_v54, 5.0 }
 0x2da   :  { %v615_v20 = vmul.f32 1.442695, %v2300_v9 }
 0x2df   :  { %v581_v56 = vpop.f32.mrf.mxu3 }
 0x2e0   :  { %v2301_v3 = vclamps-f32 %v581_v56, 5.0 }
 0x2e2   :  { %v617_v14 = vmul.f32 1.442695, %v2301_v3 }
 0x2e7   :  { %v584_v58 = vpop.f32.mrf.mxu3 }
 0x2e8   :  { %v2302_v1 = vclamps-f32 %v584_v58, 5.0 }
 0x2ea   :  { %v619_v5 = vmul.f32 1.442695, %v2302_v1 }
 0x2ef   :  { %v587_v62 = vpop.f32.mrf.mxu3 }
 0x2f0   :  { %v2303_v63 = vclamps-f32 %v587_v62, 5.0  ;;  %v3031_v62 = vpop.permute.xlu2 %632 }
 0x2f2   :  { %v621_v4 = vmul.f32 1.442695, %v2303_v63 }
 0x2f4   :  { %2492 = vpow2.f32 %v621_v4  ;;  %v3034_v4 = vpop.permute.xlu1 %627 }
 0x2f5   :  { %2494 = vpow2.f32 %v619_v5 }
 0x2f7   :  { %v590_v6 = vpop.f32.mrf.mxu3 }
 0x2f8   :  { %v2304_v11 = vclamps-f32 %v590_v6, 5.0 }
 0x2fa   :  { %v623_v16 = vmul.f32 1.442695, %v2304_v11  ;;  %v2493_v26 = vpop.eup %2492  ;;  %v224_v11 = vld [vmem:[%s2701_s29] sm:$0xff] }
 0x2fb   :  { %v2495_v31 = vpop.eup %2494  ;;  %v671_v39 = vmul.f32 %v2493_v26, %v3018_v8 }
 0x2fc   :  { %2496 = vpow2.f32 %v623_v16  ;;  %v670_v43 = vmul.f32 %v2495_v31, %v3016_v2 }
 0x2fd   :  { %2498 = vpow2.f32 %v617_v14  ;;  %v679_v51 = vmul.f32 %v671_v39, %v498_v12 }
 0x2fe   :  { %2500 = vpow2.f32 %v615_v20  ;;  %v678_v56 = vmul.f32 %v670_v43, %v495_v61 }
 0x2ff   :  { %2502 = vpow2.f32 %v613_v24 }
 0x300   :  { %2504 = vpow2.f32 %v611_v28 }
 0x301   :  { %2506 = vpow2.f32 %v609_v34 }
 0x302   :  { %v2497_v32 = vpop.eup %2496 }
 0x303   :  { %v672_v40 = vmul.f32 %v2497_v32, %v3014_v60  ;;  %v2499_v42 = vpop.eup %2498 }
 0x304   :  { %v2501_v45 = vpop.eup %2500  ;;  %v669_v49 = vmul.f32 %v2499_v42, %v3020_v30 }
 0x305   :  { %v680_v44 = vmul.f32 %v672_v40, %v501_v38  ;;  %713 = vmatpush.msrb.mxu0 %v672_v40  ;;  %v2503_v52 = vpop.eup %2502  ;;  %v668_v54 = vmul.f32 %v2501_v45, %v3027_v46 }
 0x306   :  { %v2505_v58 = vpop.eup %2504  ;;  %v677_v63 = vmul.f32 %v669_v49, %v492_v57  ;;  %v667_v1 = vmul.f32 %v2503_v52, %v3022_v37  ;;  %v2472_v52 = vld [vmem:[%s3636_s13] ss:$0 sm:$0xff] }
 0x307   :  { %693 = vmatpush.msrb.mxu2 %v680_v44  ;;  %714 = vmatpush.msrb.mxu0 %v671_v39  ;;  %v2507_v3 = vpop.eup %2506  ;;  %v666_v5 = vmul.f32 %v2505_v58, %v3031_v62  ;;  %v676_v61 = vmul.f32 %v668_v54, %v3012_v55  ;;  %v761_v55 = vld [vmem:[%s2741_s12 + $0x18] sm:$0xff] }
 0x308   :  { %v665_v6 = vmul.f32 %v2507_v3, %v3034_v4  ;;  %v675_v57 = vmul.f32 %v667_v1, %v3010_v53  ;;  %v759_v53 = vld [vmem:[%s2741_s12 + $0x8] sm:$0xff] }
 0x309   :  { %694 = vmatpush.msrb.mxu2 %v679_v51  ;;  %715 = vmatpush.msrb.mxu0 %v670_v43  ;;  %v674_v9 = vmul.f32 %v666_v5, %v3008_v50  ;;  %v758_v50 = vld [vmem:[%s2741_s12] sm:$0xff]  ;;  %s3640_s12 = sld [smem:[#allocation8_spill]] }
 0x30a   :  { %v673_v12 = vmul.f32 %v665_v6, %v3006_v48 }
 0x30b   :  { %695 = vmatpush.msrb.mxu2 %v678_v56  ;;  %716 = vmatpush.msrb.mxu0 %v669_v49 }
 0x30d   :  { %696 = vmatpush.msrb.mxu2 %v677_v63  ;;  %717 = vmatpush.msrb.mxu0 %v668_v54 }
 0x30f   :  { %697 = vmatpush.msrb.mxu2 %v676_v61  ;;  %718 = vmatpush.msrb.mxu0 %v667_v1 }
 0x311   :  { %698 = vmatpush.msrb.mxu2 %v675_v57  ;;  %719 = vmatpush.msrb.mxu0 %v666_v5 }
 0x313   :  { %699 = vmatpush.msrb.mxu2 %v674_v9  ;;  %720 = vmatpush.msrb.mxu0 %v665_v6  ;;  %v2660_v6 = vmov 32.0  }
 0x314   :  { %2306 = vmatmul.msk.f32.vlgmr.msrb.gmra.mxu0 %vm681_vm2, %v224_v11 }
 0x315   :  { %700 = vmatpush.msrb.mxu2 %v673_v12 }
 0x316   :  { %2305 = vmatmul.msk.f32.vlgmr.msrb.gmra.mxu2 %vm681_vm2, %v224_v11 }
 0x317   :  { %778 = vmatpush.msra.mxu2 %v761_v55 }
 0x319   :  { %779 = vmatpush.msra.mxu2 %v760_v13 }
 0x31b   :  { %780 = vmatpush.msra.mxu2 %v759_v53 }
 0x31d   :  { %781 = vmatpush.msra.mxu2 %v758_v50 }
 0x31e   :  { %2308 = vmatmul.msk.f32.vlgmr.msra.gmra.mxu2 %vm233_vm1, %v2970_v59  ;;  %v730_v59 = vld [vmem:[%s2731_s30 + $0x18] sm:$0xff] }
 0x31f   :  { %750 = vmatpush.msra.mxu1 %v730_v59 }
 0x326   :  { %2309 = vmatmul.msk.f32.gmra.mxu2 %vm233_vm1, %v2974_v0  ;;  %v729_v0 = vld [vmem:[%s2731_s30 + $0x10] sm:$0xff] }
 0x327   :  { %751 = vmatpush.msra.mxu1 %v729_v0 }
 0x32e   :  { %2310 = vmatmul.msk.f32.gmra.mxu2 %vm233_vm1, %v2979_v7  ;;  %v728_v7 = vld [vmem:[%s2731_s30 + $0x8] sm:$0xff] }
 0x32f   :  { %752 = vmatpush.msra.mxu1 %v728_v7 }
 0x336   :  { %2311 = vmatmul.msk.f32.gmra.mxu2 %vm233_vm1, %v2985_v17  ;;  %v727_v17 = vld [vmem:[%s2731_s30] sm:$0xff] }
 0x337   :  { %753 = vmatpush.msra.mxu1 %v727_v17 }
 0x33e   :  { %2312 = vmatmul.msk.f32.gmra.mxu2 %vm233_vm1, %v2990_v27 }
 0x346   :  { %2313 = vmatmul.msk.f32.gmra.mxu2 %vm233_vm1, %v2994_v35 }
 0x34e   :  { %2314 = vmatmul.msk.f32.gmra.mxu2 %vm233_vm1, %v2998_v41  ;;  %v3071_v41 = vld [vmem:[%s3635_s9] ss:$0 sm:$0xff] }
 0x356   :  { %2315 = vmatmul.msk.f32.gmra.mxu2 %vm233_vm1, %v3002_v47 }
 0x391   :  { %v722_v48 = vpop.f32.mrf.mxu0 }
 0x392   :  { %v723_v27 = vadd.f32 1e-06, %v722_v48 }
 0x394   :  { %2508 = vrcp.f32 %v723_v27 }
 0x395   :  { %2510 = vrcp.f32 %v2660_v6 }
 0x399   :  { %v702_v14 = vpop.f32.mrf.mxu2 }
 0x39a   :  { %v2509_v35 = vpop.eup %2508 }
 0x39b   :  { %v726_v16 = vmul.f32 %v2509_v35, %v702_v14 }
 0x39d   :  { %2307 = vmatmul.msk.f32.vlgmr.msra.gmra.mxu1 %vm233_vm1, %v726_v16 }
 0x3a1   :  { %v783_v47 = vpop.f32.mrf.mxu2 }
 0x3a2   :  { %v784_v18 = vadd.f32 %v3071_v41, %v783_v47 }
 0x3a4   :  { %v847_v20 = vadd.f32 %v784_v18, %v2881_v15 }
 0x3a6   :  { %v857_v22 = vsel %vm233_vm1, %v847_v20, 0.0 }
 0x3a7   :  { %858 = vadd.xlane.f32.xlu1 %v857_v22 }
 0x3a9   :  { %v786_v24 = vpop.f32.mrf.mxu2 }
 0x3aa   :  { %v787_v26 = vadd.f32 %v3071_v41, %v786_v24 }
 0x3ac   :  { %v848_v63 = vadd.f32 %v787_v26, %v2891_v19 }
 0x3ae   :  { %v860_v1 = vsel %vm233_vm1, %v848_v63, 0.0 }
 0x3b1   :  { %v789_v28 = vpop.f32.mrf.mxu2 }
 0x3b2   :  { %v790_v31 = vadd.f32 %v3071_v41, %v789_v28 }
 0x3b9   :  { %v792_v32 = vpop.f32.mrf.mxu2 }
 0x3ba   :  { %v793_v34 = vadd.f32 %v3071_v41, %v792_v32 }
 0x3bc   :  { %v850_v48 = vadd.f32 %v793_v34, %v2905_v23 }
 0x3be   :  { %v866_v35 = vsel %vm233_vm1, %v850_v48, 0.0 }
 0x3c1   :  { %v795_v38 = vpop.f32.mrf.mxu2 }
 0x3c2   :  { %v796_v39 = vadd.f32 %v3071_v41, %v795_v38 }
 0x3c4   :  { %v3081_v40 = vadd.f32 %v796_v39, %v2912_v25 }
 0x3c6   :  { %v869_v15 = vsel %vm233_vm1, %v3081_v40, 0.0 }
 0x3c7   :  { %870 = vadd.xlane.f32.xlu1 %v869_v15 }
 0x3c9   :  { %v798_v42 = vpop.f32.mrf.mxu2 }
 0x3ca   :  { %v799_v43 = vadd.f32 %v3071_v41, %v798_v42 }
 0x3cc   :  { %v852_v5 = vadd.f32 %v799_v43, %v2921_v29 }
 0x3ce   :  { %v872_v61 = vsel %vm233_vm1, %v852_v5, 0.0 }
 0x3d1   :  { %v801_v44 = vpop.f32.mrf.mxu2 }
 0x3d2   :  { %v802_v45 = vadd.f32 %v3071_v41, %v801_v44 }
 0x3d4   :  { %v3088_v49 = vadd.f32 %v802_v45, %v2930_v33  ;;  %v849_v33 = vadd.f32 %v790_v31, %v2898_v21 }
 0x3d6   :  { %v875_v51 = vsel %vm233_vm1, %v3088_v49, 0.0  ;;  %v863_v3 = vsel %vm233_vm1, %v849_v33, 0.0 }
 0x3d7   :  { %876 = vadd.xlane.f32.xlu1 %v875_v51 }
 0x3d9   :  { %v804_v23 = vpop.f32.mrf.mxu2 }
 0x41a   :  { %v755_v25 = vpop.f32.mrf.mxu1  ;;  %v859_v50 = vpop.xlane.xlu1 %858 }
 0x41b   :  { %v756_v54 = vadd.f32 %v2472_v52, %v755_v25  ;;  %v1058_v52 = vld [vmem:[%s3637_s17 + $0x18] sm:$0xff]  ;;  %v1057_v25 = vld [vmem:[%s3637_s17 + $0x10] sm:$0xff] }
 0x41c   :  { %1078 = vmatpush.msra.mxu0 %v1058_v52 }
 0x41d   :  { %v807_v56 = vadd.f32 %v756_v54, %v2872_v10  ;;  %v2511_v10 = vpop.eup %2510  ;;  %v1055_v54 = vld [vmem:[%s3637_s17] sm:$0xff] }
 0x41e   :  { %v814_v57 = vmul.f32 32.0, %v2511_v10  ;;  %vm818_vm3 = vweird.f32 %v2511_v10  ;;  %1079 = vmatpush.msra.mxu0 %v1057_v25 }
 0x41f   :  { %v810_v58 = vsel %vm233_vm1, %v807_v56, 0.0 }
 0x420   :  { %811 = vadd.xlane.f32.xlu2 %v810_v58  ;;  %v815_v9 = vsub.f32 1.0, %v814_v57  ;;  %v1123_v57 = vld [vmem:[%s3638_s3 + $0x8] sm:$0xff] }
 0x422   :  { %v816_v11 = vmul.f32 %v2511_v10, %v815_v9 }
 0x424   :  { %v817_v19 = vadd.f32 %v2511_v10, %v816_v11 }
 0x426   :  { %v3101_v12 = vsel %vm818_vm3, %v2511_v10, %v817_v19 }
 0x427   :  { %v881_v7 = vmul.f32 %v859_v50, %v3101_v12 }
 0x428   :  { %861 = vadd.xlane.f32.xlu2 %v860_v1  ;;  %v1125_v1 = vld [vmem:[%s3638_s3 + $0x18] sm:$0xff] }
 0x429   :  { %v3116_v14 = vsub.f32 %v847_v20, %v881_v7  ;;  %v805_v20 = vadd.f32 %v3071_v41, %v804_v23 }
 0x42b   :  { %v897_v24 = vmul.f32 %v3116_v14, %v3116_v14  ;;  %v3135_v42 = vadd.f32 %v805_v20, %v2940_v36 }
 0x42d   :  { %v905_v28 = vsel %vm233_vm1, %v897_v24, 0.0  ;;  %v878_v44 = vsel %vm233_vm1, %v3135_v42, 0.0 }
 0x430   :  { %864 = vadd.xlane.f32.xlu2 %v863_v3 }
 0x438   :  { %873 = vadd.xlane.f32.xlu2 %v872_v61  ;;  %v1124_v61 = vld [vmem:[%s3638_s3 + $0x10] sm:$0xff] }
 0x43a   :  { %v871_v32 = vpop.xlane.xlu1 %870 }
 0x43b   :  { %v885_v39 = vmul.f32 %v871_v32, %v3101_v12 }
 0x43d   :  { %v3140_v43 = vsub.f32 %v3081_v40, %v885_v39  ;;  %v1056_v40 = vld [vmem:[%s3637_s17 + $0x8] sm:$0xff] }
 0x43e   :  { %1080 = vmatpush.msra.mxu0 %v1056_v40 }
 0x43f   :  { %v901_v51 = vmul.f32 %v3140_v43, %v3140_v43 }
 0x440   :  { %1081 = vmatpush.msra.mxu0 %v1055_v54 }
 0x441   :  { %v917_v36 = vsel %vm233_vm1, %v901_v51, 0.0 }
 0x442   :  { %1166 = vmatpush.msrb.mxu0 %v1125_v1 }
 0x444   :  { %1167 = vmatpush.msrb.mxu0 %v1124_v61 }
 0x446   :  { %1168 = vmatpush.msrb.mxu0 %v1123_v57  ;;  %v3193_v57 = vld [vmem:[%s3641_s15] ss:$0 sm:$0xff] }
 0x493   :  { %v812_v55 = vpop.xlane.xlu2 %811 }
 0x494   :  { %v820_v21 = vmul.f32 %v3101_v12, %v812_v55 }
 0x496   :  { %v3104_v13 = vsub.f32 %v807_v56, %v820_v21 }
 0x498   :  { %v822_v29 = vmul.f32 %v3104_v13, %v3104_v13 }
 0x49a   :  { %v823_v53 = vsel %vm233_vm1, %v822_v29, 0.0  ;;  %v1122_v29 = vld [vmem:[%s3638_s3] sm:$0xff] }
 0x49b   :  { %824 = vadd.xlane.f32.xlu0 %v823_v53  ;;  %v862_v59 = vpop.xlane.xlu2 %861  ;;  %1169 = vmatpush.msrb.mxu0 %v1122_v29 }
 0x49c   :  { %v882_v0 = vmul.f32 %v862_v59, %v3101_v12 }
 0x49e   :  { %v3111_v17 = vsub.f32 %v848_v63, %v882_v0 }
 0x4a0   :  { %v898_v27 = vmul.f32 %v3111_v17, %v3111_v17 }
 0x4a2   :  { %v908_v16 = vsel %vm233_vm1, %v898_v27, 0.0 }
 0x4a3   :  { %867 = vadd.xlane.f32.xlu0 %v866_v35  ;;  %909 = vadd.xlane.f32.xlu2 %v908_v16  ;;  %v865_v47 = vpop.xlane.xlu2 %864 }
 0x4a4   :  { %v883_v18 = vmul.f32 %v865_v47, %v3101_v12 }
 0x4a6   :  { %v3121_v22 = vsub.f32 %v849_v33, %v883_v18  ;;  %v877_v33 = vpop.xlane.xlu1 %876 }
 0x4a7   :  { %v887_v11 = vmul.f32 %v877_v33, %v3101_v12 }
 0x4a8   :  { %v899_v26 = vmul.f32 %v3121_v22, %v3121_v22 }
 0x4a9   :  { %v3168_v59 = vsub.f32 %v3088_v49, %v887_v11 }
 0x4aa   :  { %v911_v31 = vsel %vm233_vm1, %v899_v26, 0.0 }
 0x4ab   :  { %906 = vadd.xlane.f32.xlu0 %v905_v28  ;;  %912 = vadd.xlane.f32.xlu1 %v911_v31  ;;  %v874_v34 = vpop.xlane.xlu2 %873  ;;  %v903_v49 = vmul.f32 %v3168_v59, %v3168_v59  ;;  %v2473_v28 = vld [vmem:[%s3639_s8] ss:$0 sm:$0xff] }
 0x4ac   :  { %v886_v38 = vmul.f32 %v874_v34, %v3101_v12 }
 0x4ad   :  { %v923_v34 = vsel %vm233_vm1, %v903_v49, 0.0  ;;  %v1090_v49 = vld [vmem:[%s3643_s18 + $0x18] sm:$0xff] }
 0x4ae   :  { %v3132_v15 = vsub.f32 %v852_v5, %v886_v38  ;;  %v2475_v38 = vld [vmem:[%s3640_s12] ss:$0 sm:$0xff] }
 0x4b0   :  { %v902_v41 = vmul.f32 %v3132_v15, %v3132_v15 }
 0x4b2   :  { %v920_v45 = vsel %vm233_vm1, %v902_v41, 0.0 }
 0x4b3   :  { %879 = vadd.xlane.f32.xlu0 %v878_v44  ;;  %921 = vadd.xlane.f32.xlu1 %v920_v45 }
 0x4bb   :  { %918 = vadd.xlane.f32.xlu0 %v917_v36 }
 0x50e   :  { %v825_v56 = vpop.xlane.xlu0 %824 }
 0x50f   :  { %v826_v58 = vmul.f32 %v825_v56, %v3101_v12 }
 0x511   :  { %v827_v63 = vadd.f32 1e-05, %v826_v58 }
 0x513   :  { %2512 = vrsqrt.f32 %v827_v63  ;;  %vm834_vm5 = vweird.f32 %v827_v63 }
 0x516   :  { %v868_v3 = vpop.xlane.xlu0 %867  ;;  %v910_v5 = vpop.xlane.xlu2 %909 }
 0x517   :  { %v884_v6 = vmul.f32 %v868_v3, %v3101_v12  ;;  %v930_v10 = vmul.f32 %v910_v5, %v3101_v12 }
 0x519   :  { %v2513_v9 = vpop.eup %2512  ;;  %v3159_v19 = vsub.f32 %v850_v48, %v884_v6  ;;  %v3161_v55 = vadd.f32 1e-05, %v930_v10 }
 0x51a   :  { %v829_v21 = vmul.f32 %v2513_v9, %v827_v63  ;;  %vm835_vm4 = vweird.f32 %v2513_v9 }
 0x51b   :  { %2514 = vrsqrt.f32 %v3161_v55  ;;  %v900_v53 = vmul.f32 %v3159_v19, %v3159_v19  ;;  %vm836_vm6 = vmor %vm834_vm5, %vm835_vm4  ;;  %vm961_vm11 = vweird.f32 %v3161_v55 }
 0x51c   :  { %v830_v50 = vmul.f32 %v2513_v9, %v829_v21 }
 0x51d   :  { %v914_v0 = vsel %vm233_vm1, %v900_v53, 0.0  ;;  %v3198_v53 = vld [vmem:[%s3642_s16] ss:$0 sm:$0xff] }
 0x51e   :  { %v831_v7 = vmul.f32 0.5, %v830_v50  ;;  %v907_v48 = vpop.xlane.xlu0 %906  ;;  %915 = vadd.xlane.f32.xlu2 %v914_v0  ;;  %v913_v27 = vpop.xlane.xlu1 %912 }
 0x51f   :  { %v929_v35 = vmul.f32 %v907_v48, %v3101_v12  ;;  %v931_v16 = vmul.f32 %v913_v27, %v3101_v12 }
 0x520   :  { %v832_v47 = vsub.f32 1.5, %v831_v7 }
 0x521   :  { %v2515_v18 = vpop.eup %2514  ;;  %v937_v24 = vadd.f32 1e-05, %v929_v35  ;;  %v939_v23 = vadd.f32 1e-05, %v931_v16  ;;  %v1094_v16 = vld [vmem:[%s3643_s18 + $0x38] sm:$0xff] }
 0x522   :  { %v833_v26 = vmul.f32 %v2513_v9, %v832_v47  ;;  %v956_v20 = vmul.f32 %v2515_v18, %v3161_v55  ;;  %vm962_vm8 = vweird.f32 %v2515_v18  ;;  %1110 = vmatpush.msrb.mxu1 %v1094_v16 }
 0x523   :  { %2516 = vrsqrt.f32 %v937_v24  ;;  %vm951_vm9 = vweird.f32 %v937_v24  ;;  %vm963_vm12 = vmor %vm961_vm11, %vm962_vm8  ;;  %vm971_vm14 = vweird.f32 %v939_v23 }
 0x524   :  { %v837_v31 = vsel %vm836_vm6, %v2513_v9, %v833_v26  ;;  %2518 = vrsqrt.f32 %v939_v23  ;;  %v957_v39 = vmul.f32 %v2515_v18, %v956_v20 }
 0x525   :  { %v838_v32 = vmul.f32 %v837_v31, %v3104_v13  ;;  %v1088_v31 = vld [vmem:[%s3643_s18 + $0x8] sm:$0xff] }
 0x526   :  { %v880_v41 = vpop.xlane.xlu0 %879  ;;  %924 = vadd.xlane.f32.xlu2 %v923_v34  ;;  %v958_v40 = vmul.f32 0.5, %v957_v39  ;;  %v922_v20 = vpop.xlane.xlu1 %921  ;;  %v1087_v34 = vld [vmem:[%s3643_s18] sm:$0xff] }
 0x527   :  { %v842_v44 = vmul.f32 %v2473_v28, %v838_v32  ;;  %v888_v45 = vmul.f32 %v880_v41, %v3101_v12  ;;  %v1089_v28 = vld [vmem:[%s3643_s18 + $0x10] sm:$0xff]  ;;  %v934_v32 = vmul.f32 %v922_v20, %v3101_v12 }
 0x528   :  { %v959_v63 = vsub.f32 1.5, %v958_v40  ;;  %v1209_v41 = vld [vmem:[%s3644_s22 + $0x30] sm:$0xff] }
 0x529   :  { %v2517_v51 = vpop.eup %2516  ;;  %v3182_v36 = vsub.f32 %v3135_v42, %v888_v45  ;;  %v3184_v52 = vadd.f32 %v2475_v38, %v842_v44  ;;  %v1210_v38 = vld [vmem:[%s3644_s22 + $0x38] sm:$0xff]  ;;  %v3233_v39 = vadd.f32 1e-05, %v934_v32 }
 0x52a   :  { %v2519_v25 = vpop.eup %2518  ;;  %v946_v54 = vmul.f32 %v2517_v51, %v937_v24  ;;  %vm952_vm7 = vweird.f32 %v2517_v51  ;;  %v960_v5 = vmul.f32 %v2515_v18, %v959_v63  ;;  %v1205_v63 = vld [vmem:[%s3644_s22 + $0x10] sm:$0xff] }
 0x52b   :  { %v966_v56 = vmul.f32 %v2519_v25, %v939_v23  ;;  %2316 = vmatmul.msk.f32.vlgmr.msra.gmra.mxu0 %vm233_vm1, %v3184_v52  ;;  %v904_v58 = vmul.f32 %v3182_v36, %v3182_v36  ;;  %vm953_vm10 = vmor %vm951_vm9, %vm952_vm7  ;;  %vm972_vm13 = vweird.f32 %v2519_v25  ;;  %v1091_v23 = vld [vmem:[%s3643_s18 + $0x20] sm:$0xff] }
 0x52c   :  { %v947_v13 = vmul.f32 %v2517_v51, %v946_v54  ;;  %v964_v11 = vsel %vm963_vm12, %v2515_v18, %v960_v5  ;;  %vm973_vm15 = vmor %vm971_vm14, %vm972_vm13  ;;  %v1093_v18 = vld [vmem:[%s3643_s18 + $0x30] sm:$0xff]  ;;  %v1203_v5 = vld [vmem:[%s3644_s22] sm:$0xff] }
 0x52d   :  { %v967_v33 = vmul.f32 %v2519_v25, %v966_v56  ;;  %v926_v42 = vsel %vm233_vm1, %v904_v58, 0.0  ;;  %v1026_v0 = vmul.f32 %v964_v11, %v3111_v17  ;;  %1111 = vmatpush.msrb.mxu1 %v1093_v18  ;;  %v1207_v56 = vld [vmem:[%s3644_s22 + $0x20] sm:$0xff] }
 0x52e   :  { %v948_v1 = vmul.f32 0.5, %v947_v13  ;;  %927 = vadd.xlane.f32.xlu0 %v926_v42  ;;  %v919_v47 = vpop.xlane.xlu0 %918  ;;  %v1206_v13 = vld [vmem:[%s3644_s22 + $0x18] sm:$0xff] }
 0x52f   :  { %v968_v6 = vmul.f32 0.5, %v967_v33  ;;  %v933_v24 = vmul.f32 %v919_v47, %v3101_v12 }
 0x530   :  { %v949_v3 = vsub.f32 1.5, %v948_v1 }
 0x531   :  { %v969_v21 = vsub.f32 1.5, %v968_v6  ;;  %v3225_v26 = vadd.f32 1e-05, %v933_v24 }
 0x532   :  { %v950_v61 = vmul.f32 %v2517_v51, %v949_v3  ;;  %v1204_v3 = vld [vmem:[%s3644_s22 + $0x8] sm:$0xff] }
 0x533   :  { %v970_v7 = vmul.f32 %v2519_v25, %v969_v21  ;;  %2520 = vrsqrt.f32 %v3225_v26  ;;  %vm991_vm7 = vweird.f32 %v3225_v26 }
 0x534   :  { %v954_v10 = vsel %vm953_vm10, %v2517_v51, %v950_v61  ;;  %2522 = vrsqrt.f32 %v3233_v39  ;;  %vm1001_vm10 = vweird.f32 %v3233_v39 }
 0x535   :  { %v1025_v9 = vmul.f32 %v954_v10, %v3116_v14  ;;  %v1037_v14 = vmul.f32 %v3193_v57, %v1026_v0  ;;  %v974_v55 = vsel %vm973_vm15, %v2519_v25, %v970_v7  ;;  %v1208_v25 = vld [vmem:[%s3644_s22 + $0x28] sm:$0xff] }
 0x536   :  { %v1027_v27 = vmul.f32 %v974_v55, %v3121_v22  ;;  %v1092_v22 = vld [vmem:[%s3643_s18 + $0x28] sm:$0xff] }
 0x537   :  { %v1036_v29 = vmul.f32 %v3193_v57, %v1025_v9  ;;  %v3208_v48 = vadd.f32 %v3198_v53, %v1037_v14  ;;  %1112 = vmatpush.msrb.mxu1 %v1092_v22 }
 0x538   :  { %v1038_v17 = vmul.f32 %v3193_v57, %v1027_v27 }
 0x539   :  { %v3201_v50 = vadd.f32 %v3198_v53, %v1036_v29  ;;  %1113 = vmatpush.msrb.mxu1 %v1091_v23  ;;  %v2521_v44 = vpop.eup %2520  ;;  %v2477_v23 = vld [vmem:[%s3645_s23] ss:$0 sm:$0xff] }
 0x53a   :  { %v3215_v35 = vadd.f32 %v3198_v53, %v1038_v17  ;;  %v986_v40 = vmul.f32 %v2521_v44, %v3225_v26  ;;  %v2523_v1 = vpop.eup %2522  ;;  %vm992_vm4 = vweird.f32 %v2521_v44 }
 0x53b   :  { %2318 = vmatmul.msk.f32.vlgmr.msrb.gmra.mxu0 %vm233_vm1, %v3201_v50  ;;  %1114 = vmatpush.msrb.mxu1 %v1090_v49  ;;  %v996_v6 = vmul.f32 %v2523_v1, %v3233_v39  ;;  %vm993_vm8 = vmor %vm991_vm7, %vm992_vm4  ;;  %vm1002_vm9 = vweird.f32 %v2523_v1 }
 0x53c   :  { %v987_v58 = vmul.f32 %v2521_v44, %v986_v40  ;;  %vm1003_vm11 = vmor %vm1001_vm10, %vm1002_vm9 }
 0x53d   :  { %1115 = vmatpush.msrb.mxu1 %v1089_v28  ;;  %v997_v29 = vmul.f32 %v2523_v1, %v996_v6 }
 0x53e   :  { %v988_v10 = vmul.f32 0.5, %v987_v58 }
 0x53f   :  { %1116 = vmatpush.msrb.mxu1 %v1088_v31  ;;  %v998_v16 = vmul.f32 0.5, %v997_v29 }
 0x540   :  { %v989_v0 = vsub.f32 1.5, %v988_v10 }
 0x541   :  { %1117 = vmatpush.msrb.mxu1 %v1087_v34  ;;  %v999_v31 = vsub.f32 1.5, %v998_v16 }
 0x542   :  { %v990_v47 = vmul.f32 %v2521_v44, %v989_v0 }
 0x543   :  { %2319 = vmatmul.msk.f32.gmra.mxu0 %vm233_vm1, %v3208_v48  ;;  %1247 = vmatpush.msra.mxu1 %v1210_v38  ;;  %v1000_v26 = vmul.f32 %v2523_v1, %v999_v31 }
 0x544   :  { %v994_v32 = vsel %vm993_vm8, %v2521_v44, %v990_v47 }
 0x545   :  { %1248 = vmatpush.msra.mxu1 %v1209_v41 }
 0x547   :  { %1249 = vmatpush.msra.mxu1 %v1208_v25  ;;  %v1029_v25 = vmul.f32 %v994_v32, %v3140_v43 }
 0x549   :  { %1250 = vmatpush.msra.mxu1 %v1207_v56  ;;  %v1040_v44 = vmul.f32 %v3193_v57, %v1029_v25  ;;  %v1004_v56 = vsel %vm1003_vm11, %v2523_v1, %v1000_v26 }
 0x54b   :  { %2320 = vmatmul.msk.f32.gmra.mxu0 %vm233_vm1, %v3215_v35  ;;  %1251 = vmatpush.msra.mxu1 %v1206_v13  ;;  %v3262_v43 = vadd.f32 %v3198_v53, %v1040_v44 }
 0x54d   :  { %1252 = vmatpush.msra.mxu1 %v1205_v63  ;;  %v1030_v63 = vmul.f32 %v1004_v56, %v3132_v15 }
 0x54f   :  { %1253 = vmatpush.msra.mxu1 %v1204_v3  ;;  %v3266_v3 = vld [vmem:[%s3646_s26] ss:$0 sm:$0xff]  ;;  %v1041_v1 = vmul.f32 %v3193_v57, %v1030_v63 }
 0x551   :  { %1254 = vmatpush.msra.mxu1 %v1203_v5  ;;  %v3273_v15 = vadd.f32 %v3198_v53, %v1041_v1 }
 0x591   :  { %v916_v45 = vpop.xlane.xlu2 %915 }
 0x592   :  { %v932_v51 = vmul.f32 %v916_v45, %v3101_v12 }
 0x594   :  { %v940_v54 = vadd.f32 1e-05, %v932_v51 }
 0x596   :  { %2524 = vrsqrt.f32 %v940_v54  ;;  %vm981_vm5 = vweird.f32 %v940_v54 }
 0x599   :  { %v925_v33 = vpop.xlane.xlu2 %924 }
 0x59a   :  { %v935_v42 = vmul.f32 %v925_v33, %v3101_v12 }
 0x59c   :  { %v2525_v61 = vpop.eup %2524  ;;  %v943_v9 = vadd.f32 1e-05, %v935_v42 }
 0x59d   :  { %v976_v11 = vmul.f32 %v2525_v61, %v940_v54  ;;  %vm982_vm3 = vweird.f32 %v2525_v61 }
 0x59e   :  { %2526 = vrsqrt.f32 %v943_v9  ;;  %vm983_vm6 = vmor %vm981_vm5, %vm982_vm3  ;;  %vm1011_vm13 = vweird.f32 %v943_v9 }
 0x59f   :  { %v977_v21 = vmul.f32 %v2525_v61, %v976_v11 }
 0x5a1   :  { %v978_v7 = vmul.f32 0.5, %v977_v21  ;;  %v928_v14 = vpop.xlane.xlu0 %927 }
 0x5a2   :  { %v936_v27 = vmul.f32 %v928_v14, %v3101_v12 }
 0x5a3   :  { %v979_v55 = vsub.f32 1.5, %v978_v7 }
 0x5a4   :  { %v2527_v17 = vpop.eup %2526  ;;  %v944_v24 = vadd.f32 1e-05, %v936_v27 }
 0x5a5   :  { %v980_v18 = vmul.f32 %v2525_v61, %v979_v55  ;;  %v1006_v22 = vmul.f32 %v2527_v17, %v943_v9  ;;  %vm1012_vm12 = vweird.f32 %v2527_v17 }
 0x5a6   :  { %2528 = vrsqrt.f32 %v944_v24  ;;  %vm1013_vm14 = vmor %vm1011_vm13, %vm1012_vm12  ;;  %vm1021_vm3 = vweird.f32 %v944_v24 }
 0x5a7   :  { %v984_v49 = vsel %vm983_vm6, %v2525_v61, %v980_v18  ;;  %v1007_v34 = vmul.f32 %v2527_v17, %v1006_v22 }
 0x5a8   :  { %v1083_v20 = vpop.f32.mrf.mxu0  ;;  %v1028_v28 = vmul.f32 %v984_v49, %v3159_v19 }
 0x5a9   :  { %v1084_v38 = vadd.f32 %v2477_v23, %v1083_v20  ;;  %v1008_v54 = vmul.f32 0.5, %v1007_v34  ;;  %v3303_v34 = vld [vmem:[%s3648_s1] ss:$0 sm:$0xff] }
 0x5aa   :  { %v1039_v41 = vmul.f32 %v3193_v57, %v1028_v28 }
 0x5ab   :  { %v1086_v45 = vmax.f32 %v1084_v38, 0.0  ;;  %v1009_v13 = vsub.f32 1.5, %v1008_v54 }
 0x5ac   :  { %v3253_v51 = vadd.f32 %v3198_v53, %v1039_v41  ;;  %v2529_v40 = vpop.eup %2528 }
 0x5ad   :  { %2317 = vmatmul.msk.f32.vlgmr.msrb.gmra.mxu1 %vm681_vm2, %v1086_v45  ;;  %v1016_v19 = vmul.f32 %v2529_v40, %v944_v24  ;;  %v1010_v33 = vmul.f32 %v2527_v17, %v1009_v13  ;;  %vm1022_vm15 = vweird.f32 %v2529_v40 }
 0x5ae   :  { %2321 = vmatmul.msk.f32.gmra.mxu0 %vm233_vm1, %v3253_v51  ;;  %vm1023_vm4 = vmor %vm1021_vm3, %vm1022_vm15 }
 0x5af   :  { %v1017_v58 = vmul.f32 %v2529_v40, %v1016_v19  ;;  %v1014_v5 = vsel %vm1013_vm14, %v2527_v17, %v1010_v33 }
 0x5b0   :  { %v1031_v11 = vmul.f32 %v1014_v5, %v3168_v59 }
 0x5b1   :  { %v1018_v42 = vmul.f32 0.5, %v1017_v58 }
 0x5b2   :  { %v1042_v29 = vmul.f32 %v3193_v57, %v1031_v11 }
 0x5b3   :  { %v1019_v61 = vsub.f32 1.5, %v1018_v42 }
 0x5b4   :  { %v3282_v55 = vadd.f32 %v3198_v53, %v1042_v29 }
 0x5b5   :  { %v1020_v21 = vmul.f32 %v2529_v40, %v1019_v61 }
 0x5b6   :  { %2322 = vmatmul.msk.f32.gmra.mxu0 %vm233_vm1, %v3262_v43 }
 0x5b7   :  { %v1024_v0 = vsel %vm1023_vm4, %v2529_v40, %v1020_v21 }
 0x5b8   :  { %v1171_v39 = vpop.f32.mrf.mxu0  ;;  %v1032_v59 = vmul.f32 %v1024_v0, %v3182_v36  ;;  %v2479_v36 = vld [vmem:[%s3647_s28] ss:$0 sm:$0xff] }
 0x5b9   :  { %v1172_v6 = vadd.f32 %v3266_v3, %v1171_v39 }
 0x5ba   :  { %v1043_v17 = vmul.f32 %v3193_v57, %v1032_v59 }
 0x5bb   :  { %v1195_v10 = vmax.f32 %v1172_v6, 0.0 }
 0x5bc   :  { %v3291_v18 = vadd.f32 %v3198_v53, %v1043_v17 }
 0x5bd   :  { %2326 = vmatmul.msk.f32.vlgmr.msra.gmra.mxu1 %vm681_vm2, %v1195_v10 }
 0x5be   :  { %2323 = vmatmul.msk.f32.gmra.mxu0 %vm233_vm1, %v3273_v15 }
 0x5c0   :  { %v1174_v9 = vpop.f32.mrf.mxu0 }
 0x5c1   :  { %v1175_v7 = vadd.f32 %v3266_v3, %v1174_v9 }
 0x5c3   :  { %v1196_v14 = vmax.f32 %v1175_v7, 0.0 }
 0x5c5   :  { %2327 = vmatmul.msk.f32.gmra.mxu1 %vm681_vm2, %v1196_v14 }
 0x5c6   :  { %2324 = vmatmul.msk.f32.gmra.mxu0 %vm233_vm1, %v3282_v55 }
 0x5c8   :  { %v1177_v27 = vpop.f32.mrf.mxu0 }
 0x5c9   :  { %v1178_v16 = vadd.f32 %v3266_v3, %v1177_v27 }
 0x5cb   :  { %v1197_v47 = vmax.f32 %v1178_v16, 0.0 }
 0x5cd   :  { %2328 = vmatmul.msk.f32.gmra.mxu1 %vm681_vm2, %v1197_v47 }
 0x5ce   :  { %2325 = vmatmul.msk.f32.gmra.mxu0 %vm233_vm1, %v3291_v18 }
 0x62a   :  { %v1119_v22 = vpop.f32.mrf.mxu1 }
 0x62b   :  { %v1120_v24 = vadd.f32 %v2479_v36, %v1119_v22  ;;  %v1180_v23 = vpop.f32.mrf.mxu0 }
 0x62c   :  { %v1181_v49 = vadd.f32 %v3266_v3, %v1180_v23 }
 0x62d   :  { %v1280_v57 = vadd.f32 %v1120_v24, %v3184_v52 }
 0x62e   :  { %v1198_v20 = vmax.f32 %v1181_v49, 0.0 }
 0x62f   :  { %v1283_v28 = vsel %vm233_vm1, %v1280_v57, 0.0 }
 0x630   :  { %1284 = vadd.xlane.f32.xlu1 %v1283_v28  ;;  %2329 = vmatmul.msk.f32.gmra.mxu1 %vm681_vm2, %v1198_v20 }
 0x633   :  { %v1183_v53 = vpop.f32.mrf.mxu0 }
 0x634   :  { %v1184_v31 = vadd.f32 %v3266_v3, %v1183_v53 }
 0x636   :  { %v1199_v32 = vmax.f32 %v1184_v31, 0.0 }
 0x638   :  { %2330 = vmatmul.msk.f32.gmra.mxu1 %vm681_vm2, %v1199_v32 }
 0x63a   :  { %v1256_v38 = vpop.f32.mrf.mxu1 }
 0x63b   :  { %v1257_v41 = vadd.f32 %v3303_v34, %v1256_v38  ;;  %v1186_v45 = vpop.f32.mrf.mxu0 }
 0x63c   :  { %v1187_v52 = vadd.f32 %v3266_v3, %v1186_v45 }
 0x63d   :  { %v1313_v25 = vadd.f32 %v1257_v41, %v3201_v50 }
 0x63e   :  { %v1200_v40 = vmax.f32 %v1187_v52, 0.0 }
 0x63f   :  { %v1323_v26 = vsel %vm233_vm1, %v1313_v25, 0.0 }
 0x640   :  { %1324 = vadd.xlane.f32.xlu0 %v1323_v26  ;;  %2331 = vmatmul.msk.f32.gmra.mxu1 %vm681_vm2, %v1200_v40  ;;  %v2335_v40 = vld [vmem:[%s2721_s19 + $0x28] sm:$0xff]  ;;  %v2334_v26 = vld [vmem:[%s2721_s19 + $0x20] sm:$0xff] }
 0x642   :  { %v1259_v54 = vpop.f32.mrf.mxu1 }
 0x643   :  { %v1260_v19 = vadd.f32 %v3303_v34, %v1259_v54  ;;  %v1189_v44 = vpop.f32.mrf.mxu0 }
 0x644   :  { %v1190_v56 = vadd.f32 %v3266_v3, %v1189_v44 }
 0x645   :  { %v1314_v13 = vadd.f32 %v1260_v19, %v3208_v48 }
 0x646   :  { %v1201_v58 = vmax.f32 %v1190_v56, 0.0 }
 0x647   :  { %v1326_v63 = vsel %vm233_vm1, %v1314_v13, 0.0 }
 0x648   :  { %1327 = vadd.xlane.f32.xlu1 %v1326_v63  ;;  %2332 = vmatmul.msk.f32.gmra.mxu1 %vm681_vm2, %v1201_v58 }
 0x64a   :  { %v1262_v5 = vpop.f32.mrf.mxu1 }
 0x64b   :  { %v1192_v50 = vpop.f32.mrf.mxu0  ;;  %v1263_v6 = vadd.f32 %v3303_v34, %v1262_v5  ;;  %v2339_v5 = vld [vmem:[%s2726_s24 + $0x20] sm:$0xff] }
 0x64c   :  { %v1193_v33 = vadd.f32 %v3266_v3, %v1192_v50  ;;  %v2340_v50 = vld [vmem:[%s2726_s24 + $0x28] sm:$0xff] }
 0x64d   :  { %v1315_v21 = vadd.f32 %v1263_v6, %v3215_v35 }
 0x64e   :  { %v1202_v42 = vmax.f32 %v1193_v33, 0.0 }
 0x64f   :  { %v1329_v29 = vsel %vm233_vm1, %v1315_v21, 0.0 }
 0x650   :  { %2333 = vmatmul.msk.f32.gmra.mxu1 %vm681_vm2, %v1202_v42 }
 0x6a3   :  { %v1285_v39 = vpop.xlane.xlu1 %1284 }
 0x6a4   :  { %v1286_v1 = vmul.f32 %v1285_v39, %v3101_v12 }
 0x6a6   :  { %v3319_v61 = vsub.f32 %v1280_v57, %v1286_v1 }
 0x6a8   :  { %v1288_v48 = vmul.f32 %v3319_v61, %v3319_v61 }
 0x6aa   :  { %v1289_v10 = vsel %vm233_vm1, %v1288_v48, 0.0 }
 0x6ab   :  { %1290 = vadd.xlane.f32.xlu2 %v1289_v10 }
 0x6ad   :  { %v1265_v11 = vpop.f32.mrf.mxu1 }
 0x6ae   :  { %v1266_v3 = vadd.f32 %v3303_v34, %v1265_v11  ;;  %v2572_v11 = vld [vmem:[%s2716_s14 + $0x18] sm:$0xff] }
 0x6b0   :  { %v1316_v9 = vadd.f32 %v1266_v3, %v3253_v51 }
 0x6b2   :  { %v1332_v0 = vsel %vm233_vm1, %v1316_v9, 0.0 }
 0x6b3   :  { %v1325_v7 = vpop.xlane.xlu0 %1324  ;;  %1330 = vadd.xlane.f32.xlu2 %v1329_v29  ;;  %1333 = vadd.xlane.f32.xlu0 %v1332_v0 }
 0x6b4   :  { %v1347_v14 = vmul.f32 %v1325_v7, %v3101_v12 }
 0x6b5   :  { %v1268_v59 = vpop.f32.mrf.mxu1 }
 0x6b6   :  { %v3331_v27 = vsub.f32 %v1313_v25, %v1347_v14  ;;  %v1269_v17 = vadd.f32 %v3303_v34, %v1268_v59  ;;  %v2336_v25 = vld [vmem:[%s2721_s19 + $0x30] sm:$0xff] }
 0x6b7   :  { %v2573_v59 = vld [vmem:[%s2716_s14 + $0x10] sm:$0xff] }
 0x6b8   :  { %v3335_v16 = vadd.f32 %v1269_v17, %v3262_v43  ;;  %v1363_v35 = vmul.f32 %v3331_v27, %v3331_v27 }
 0x6ba   :  { %v1335_v51 = vsel %vm233_vm1, %v3335_v16, 0.0  ;;  %v1371_v47 = vsel %vm233_vm1, %v1363_v35, 0.0 }
 0x6bb   :  { %v1328_v36 = vpop.xlane.xlu1 %1327  ;;  %1336 = vadd.xlane.f32.xlu1 %v1335_v51  ;;  %1372 = vadd.xlane.f32.xlu0 %v1371_v47  ;;  %v2574_v47 = vld [vmem:[%s2716_s14 + $0x8] sm:$0xff] }
 0x6bc   :  { %v1348_v24 = vmul.f32 %v1328_v36, %v3101_v12 }
 0x6bd   :  { %v1271_v22 = vpop.f32.mrf.mxu1 }
 0x6be   :  { %v1272_v23 = vadd.f32 %v3303_v34, %v1271_v22  ;;  %v3347_v43 = vsub.f32 %v1314_v13, %v1348_v24  ;;  %v2341_v13 = vld [vmem:[%s2726_s24 + $0x30] sm:$0xff] }
 0x6c0   :  { %v3345_v49 = vadd.f32 %v1272_v23, %v3273_v15  ;;  %v1364_v53 = vmul.f32 %v3347_v43, %v3347_v43  ;;  %v2575_v23 = vld [vmem:[%s2716_s14] sm:$0xff]  ;;  %s3651_s14 = sld [smem:[#allocation21_spill]] }
 0x6c2   :  { %v1338_v57 = vsel %vm233_vm1, %v3345_v49, 0.0  ;;  %v1374_v15 = vsel %vm233_vm1, %v1364_v53, 0.0 }
 0x6c3   :  { %1339 = vadd.xlane.f32.xlu2 %v1338_v57 }
 0x6c5   :  { %v1274_v20 = vpop.f32.mrf.mxu1 }
 0x6c6   :  { %v1275_v28 = vadd.f32 %v3303_v34, %v1274_v20 }
 0x6c8   :  { %v3355_v31 = vadd.f32 %v1275_v28, %v3282_v55  ;;  %v2337_v55 = vld [vmem:[%s2721_s19 + $0x38] sm:$0xff]  ;;  %s3649_s19 = sld [smem:[#allocation19_spill]] }
 0x6c9   :  { %1541 = vmatpush.msrb.mxu1 %v2337_v55 }
 0x6ca   :  { %v1341_v32 = vsel %vm233_vm1, %v3355_v31, 0.0 }
 0x6cb   :  { %1375 = vadd.xlane.f32.xlu2 %v1374_v15  ;;  %1342 = vadd.xlane.f32.xlu1 %v1341_v32 }
 0x6cc   :  { %1542 = vmatpush.msrb.mxu1 %v2336_v25 }
 0x6cd   :  { %v1277_v38 = vpop.f32.mrf.mxu1 }
 0x6ce   :  { %v1278_v41 = vadd.f32 %v3303_v34, %v1277_v38  ;;  %1543 = vmatpush.msrb.mxu1 %v2335_v40  ;;  %v2481_v22 = vld [vmem:[%s3649_s19] ss:$0 sm:$0xff] }
 0x6d0   :  { %v3362_v45 = vadd.f32 %v1278_v41, %v3291_v18  ;;  %1544 = vmatpush.msrb.mxu1 %v2334_v26  ;;  %v2342_v18 = vld [vmem:[%s2726_s24 + $0x38] sm:$0xff]  ;;  %s3650_s24 = sld [smem:[#allocation20_spill]] }
 0x6d1   :  { %1590 = vmatpush.msra.mxu3 %v2342_v18 }
 0x6d2   :  { %v1344_v52 = vsel %vm233_vm1, %v3362_v45, 0.0 }
 0x6d3   :  { %1345 = vadd.xlane.f32.xlu0 %v1344_v52  ;;  %1591 = vmatpush.msra.mxu3 %v2341_v13 }
 0x6d5   :  { %1592 = vmatpush.msra.mxu3 %v2340_v50 }
 0x6d7   :  { %1593 = vmatpush.msra.mxu3 %v2339_v5  ;;  %v3426_v5 = vld [vmem:[%s3652_s2] ss:$0 sm:$0xff] }
 0x6d9   :  { %1809 = vmatpush.msrb.mxu3 %v2572_v11 }
 0x6db   :  { %1810 = vmatpush.msrb.mxu3 %v2573_v59 }
 0x6dd   :  { %1811 = vmatpush.msrb.mxu3 %v2574_v47 }
 0x6df   :  { %1812 = vmatpush.msrb.mxu3 %v2575_v23 }
 0x71e   :  { %v1291_v54 = vpop.xlane.xlu2 %1290 }
 0x71f   :  { %v1292_v34 = vmul.f32 %v1291_v54, %v3101_v12 }
 0x721   :  { %v1293_v19 = vadd.f32 1e-05, %v1292_v34 }
 0x723   :  { %2530 = vrsqrt.f32 %v1293_v19  ;;  %vm1300_vm6 = vweird.f32 %v1293_v19 }
 0x726   :  { %v1334_v44 = vpop.xlane.xlu0 %1333  ;;  %v1331_v56 = vpop.xlane.xlu2 %1330 }
 0x727   :  { %v1350_v58 = vmul.f32 %v1334_v44, %v3101_v12  ;;  %v1349_v63 = vmul.f32 %v1331_v56, %v3101_v12 }
 0x729   :  { %v2531_v33 = vpop.eup %2530  ;;  %v3376_v42 = vsub.f32 %v1316_v9, %v1350_v58  ;;  %v3378_v39 = vsub.f32 %v1315_v21, %v1349_v63  ;;  %v3419_v58 = vld [vmem:[%s3651_s14] ss:$0 sm:$0xff] }
 0x72a   :  { %v1295_v1 = vmul.f32 %v2531_v33, %v1293_v19  ;;  %vm1301_vm5 = vweird.f32 %v2531_v33 }
 0x72b   :  { %v1366_v48 = vmul.f32 %v3376_v42, %v3376_v42  ;;  %v1365_v6 = vmul.f32 %v3378_v39, %v3378_v39  ;;  %vm1302_vm7 = vmor %vm1300_vm6, %vm1301_vm5 }
 0x72c   :  { %v1296_v10 = vmul.f32 %v2531_v33, %v1295_v1 }
 0x72d   :  { %v1380_v3 = vsel %vm233_vm1, %v1366_v48, 0.0  ;;  %v1377_v21 = vsel %vm233_vm1, %v1365_v6, 0.0 }
 0x72e   :  { %v1297_v9 = vmul.f32 0.5, %v1296_v10  ;;  %v1337_v29 = vpop.xlane.xlu1 %1336  ;;  %1381 = vadd.xlane.f32.xlu2 %v1380_v3  ;;  %v1373_v0 = vpop.xlane.xlu0 %1372  ;;  %1378 = vadd.xlane.f32.xlu1 %v1377_v21 }
 0x72f   :  { %v1351_v7 = vmul.f32 %v1337_v29, %v3101_v12  ;;  %v1395_v14 = vmul.f32 %v1373_v0, %v3101_v12 }
 0x730   :  { %v1298_v17 = vsub.f32 1.5, %v1297_v9 }
 0x731   :  { %v3392_v35 = vsub.f32 %v3335_v16, %v1351_v7  ;;  %v1403_v51 = vadd.f32 1e-05, %v1395_v14  ;;  %v2483_v16 = vld [vmem:[%s3650_s24] ss:$0 sm:$0xff] }
 0x732   :  { %v1299_v36 = vmul.f32 %v2531_v33, %v1298_v17 }
 0x733   :  { %2532 = vrsqrt.f32 %v1403_v51  ;;  %v1367_v24 = vmul.f32 %v3392_v35, %v3392_v35  ;;  %vm1417_vm9 = vweird.f32 %v1403_v51 }
 0x734   :  { %v1303_v57 = vsel %vm1302_vm7, %v2531_v33, %v1299_v36 }
 0x735   :  { %v1304_v20 = vmul.f32 %v1303_v57, %v3319_v61  ;;  %v1383_v28 = vsel %vm233_vm1, %v1367_v24, 0.0 }
 0x736   :  { %1384 = vadd.xlane.f32.xlu1 %v1383_v28  ;;  %v1340_v53 = vpop.xlane.xlu2 %1339 }
 0x737   :  { %v1308_v15 = vmul.f32 %v2481_v22, %v1304_v20  ;;  %v1352_v32 = vmul.f32 %v1340_v53, %v3101_v12 }
 0x739   :  { %v2533_v38 = vpop.eup %2532  ;;  %v3404_v41 = vsub.f32 %v3345_v49, %v1352_v32  ;;  %v3406_v52 = vadd.f32 %v2483_v16, %v1308_v15 }
 0x73a   :  { %v1412_v55 = vmul.f32 %v2533_v38, %v1403_v51  ;;  %vm1418_vm8 = vweird.f32 %v2533_v38 }
 0x73b   :  { %2338 = vmatmul.msk.f32.vlgmr.msrb.gmra.mxu1 %vm233_vm1, %v3406_v52  ;;  %v1368_v61 = vmul.f32 %v3404_v41, %v3404_v41  ;;  %vm1419_vm10 = vmor %vm1417_vm9, %vm1418_vm8 }
 0x73c   :  { %v1413_v25 = vmul.f32 %v2533_v38, %v1412_v55 }
 0x73d   :  { %v1386_v40 = vsel %vm233_vm1, %v1368_v61, 0.0 }
 0x73e   :  { %v1414_v26 = vmul.f32 0.5, %v1413_v25  ;;  %v1343_v54 = vpop.xlane.xlu1 %1342  ;;  %1387 = vadd.xlane.f32.xlu2 %v1386_v40  ;;  %v1376_v34 = vpop.xlane.xlu2 %1375 }
 0x73f   :  { %v1353_v49 = vmul.f32 %v1343_v54, %v3101_v12  ;;  %v1396_v19 = vmul.f32 %v1376_v34, %v3101_v12 }
 0x740   :  { %v1415_v18 = vsub.f32 1.5, %v1414_v26 }
 0x741   :  { %v3416_v44 = vsub.f32 %v3355_v31, %v1353_v49  ;;  %v1404_v56 = vadd.f32 1e-05, %v1396_v19 }
 0x742   :  { %v1416_v13 = vmul.f32 %v2533_v38, %v1415_v18 }
 0x743   :  { %2534 = vrsqrt.f32 %v1404_v56  ;;  %v1369_v63 = vmul.f32 %v3416_v44, %v3416_v44  ;;  %vm1427_vm12 = vweird.f32 %v1404_v56 }
 0x744   :  { %v1420_v50 = vsel %vm1419_vm10, %v2533_v38, %v1416_v13 }
 0x745   :  { %v1491_v33 = vmul.f32 %v1420_v50, %v3331_v27  ;;  %v1389_v1 = vsel %vm233_vm1, %v1369_v63, 0.0 }
 0x746   :  { %v1346_v48 = vpop.xlane.xlu0 %1345  ;;  %1390 = vadd.xlane.f32.xlu1 %v1389_v1 }
 0x747   :  { %v1502_v31 = vmul.f32 %v3419_v58, %v1491_v33  ;;  %v1354_v6 = vmul.f32 %v1346_v48, %v3101_v12 }
 0x749   :  { %v2535_v10 = vpop.eup %2534  ;;  %v3431_v11 = vsub.f32 %v3362_v45, %v1354_v6  ;;  %v1513_v3 = vadd.f32 %v3426_v5, %v1502_v31 }
 0x74a   :  { %v1422_v21 = vmul.f32 %v2535_v10, %v1404_v56  ;;  %vm1428_vm11 = vweird.f32 %v2535_v10 }
 0x74b   :  { %2343 = vmatmul.msk.f32.vlgmr.msra.gmra.mxu3 %vm233_vm1, %v1513_v3  ;;  %v1370_v27 = vmul.f32 %v3431_v11, %v3431_v11  ;;  %vm1429_vm13 = vmor %vm1427_vm12, %vm1428_vm11 }
 0x74c   :  { %v1423_v9 = vmul.f32 %v2535_v10, %v1422_v21 }
 0x74d   :  { %v1392_v29 = vsel %vm233_vm1, %v1370_v27, 0.0  ;;  %v2576_v27 = vld [vmem:[%s2691_s21] sm:$0xff] }
 0x74e   :  { %v1424_v0 = vmul.f32 0.5, %v1423_v9  ;;  %1393 = vadd.xlane.f32.xlu2 %v1392_v29 }
 0x750   :  { %v1425_v7 = vsub.f32 1.5, %v1424_v0 }
 0x752   :  { %v1426_v14 = vmul.f32 %v2535_v10, %v1425_v7 }
 0x754   :  { %v1430_v45 = vsel %vm1429_vm13, %v2535_v10, %v1426_v14 }
 0x755   :  { %v1492_v59 = vmul.f32 %v1430_v45, %v3347_v43 }
 0x757   :  { %v1503_v17 = vmul.f32 %v3419_v58, %v1492_v59 }
 0x759   :  { %v1514_v51 = vadd.f32 %v3426_v5, %v1503_v17 }
 0x75b   :  { %2344 = vmatmul.msk.f32.gmra.mxu3 %vm233_vm1, %v1514_v51 }
 0x7a1   :  { %v1379_v47 = vpop.xlane.xlu1 %1378  ;;  %v1382_v36 = vpop.xlane.xlu2 %1381 }
 0x7a2   :  { %v1397_v22 = vmul.f32 %v1379_v47, %v3101_v12  ;;  %v1398_v24 = vmul.f32 %v1382_v36, %v3101_v12 }
 0x7a4   :  { %v1405_v23 = vadd.f32 1e-05, %v1397_v22  ;;  %v1406_v57 = vadd.f32 1e-05, %v1398_v24  ;;  %v2577_v24 = vld [vmem:[%s2691_s21 + $0x8] sm:$0xff] }
 0x7a6   :  { %2536 = vrsqrt.f32 %v1405_v23  ;;  %vm1437_vm15 = vweird.f32 %v1405_v23  ;;  %vm1447_vm5 = vweird.f32 %v1406_v57 }
 0x7a7   :  { %2538 = vrsqrt.f32 %v1406_v57 }
 0x7a9   :  { %v1385_v20 = vpop.xlane.xlu1 %1384 }
 0x7aa   :  { %v1399_v28 = vmul.f32 %v1385_v20, %v3101_v12 }
 0x7ac   :  { %v2537_v43 = vpop.eup %2536  ;;  %v1407_v16 = vadd.f32 1e-05, %v1399_v28 }
 0x7ad   :  { %v2539_v53 = vpop.eup %2538  ;;  %v1432_v15 = vmul.f32 %v2537_v43, %v1405_v23  ;;  %vm1438_vm14 = vweird.f32 %v2537_v43 }
 0x7ae   :  { %v1442_v32 = vmul.f32 %v2539_v53, %v1406_v57  ;;  %2540 = vrsqrt.f32 %v1407_v16  ;;  %vm1448_vm3 = vweird.f32 %v2539_v53  ;;  %vm1439_vm4 = vmor %vm1437_vm15, %vm1438_vm14  ;;  %vm1457_vm8 = vweird.f32 %v1407_v16 }
 0x7af   :  { %v1433_v38 = vmul.f32 %v2537_v43, %v1432_v15  ;;  %vm3446_vm6 = vmor %vm1447_vm5, %vm1448_vm3 }
 0x7b0   :  { %v1443_v55 = vmul.f32 %v2539_v53, %v1442_v32 }
 0x7b1   :  { %v1434_v61 = vmul.f32 0.5, %v1433_v38  ;;  %v1388_v25 = vpop.xlane.xlu2 %1387 }
 0x7b2   :  { %v1444_v40 = vmul.f32 0.5, %v1443_v55  ;;  %v1400_v26 = vmul.f32 %v1388_v25, %v3101_v12  ;;  %v2578_v55 = vld [vmem:[%s2691_s21 + $0x10] sm:$0xff] }
 0x7b3   :  { %v1435_v54 = vsub.f32 1.5, %v1434_v61 }
 0x7b4   :  { %v2541_v34 = vpop.eup %2540  ;;  %v1445_v49 = vsub.f32 1.5, %v1444_v40  ;;  %v1408_v19 = vadd.f32 1e-05, %v1400_v26 }
 0x7b5   :  { %v1436_v18 = vmul.f32 %v2537_v43, %v1435_v54  ;;  %v1452_v56 = vmul.f32 %v2541_v34, %v1407_v16  ;;  %vm1458_vm7 = vweird.f32 %v2541_v34 }
 0x7b6   :  { %v1446_v13 = vmul.f32 %v2539_v53, %v1445_v49  ;;  %2542 = vrsqrt.f32 %v1408_v19  ;;  %vm1459_vm9 = vmor %vm1457_vm8, %vm1458_vm7  ;;  %vm1467_vm11 = vweird.f32 %v1408_v19 }
 0x7b7   :  { %v1440_v63 = vsel %vm1439_vm4, %v2537_v43, %v1436_v18  ;;  %v1453_v50 = vmul.f32 %v2541_v34, %v1452_v56  ;;  %v2579_v56 = vld [vmem:[%s2691_s21 + $0x18] sm:$0xff] }
 0x7b8   :  { %v1546_v1 = vpop.f32.mrf.mxu1  ;;  %v1493_v48 = vmul.f32 %v1440_v63, %v3378_v39  ;;  %v1450_v31 = vsel %vm3446_vm6, %v2539_v53, %v1446_v13 }
 0x7b9   :  { %v1454_v6 = vmul.f32 0.5, %v1453_v50  ;;  %1661 = vrot.lane.b32.xlu0 %v1546_v1, %s2657_s0  ;;  %1634 = vmatpush.msrb.mxu2 %v1546_v1  ;;  %v1391_v10 = vpop.xlane.xlu1 %1390  ;;  %v1494_v7 = vmul.f32 %v1450_v31, %v3376_v42 }
 0x7ba   :  { %1705 = vrot.lane.b32.xlu1 %v1546_v1, %s2658_s5  ;;  %v1401_v3 = vmul.f32 %v1391_v10, %v3101_v12  ;;  %v1504_v21 = vmul.f32 %v3419_v58, %v1493_v48  ;;  %2351 = vmatmul.msk.f32.vlgmr.msrb.gmra.mxu2 %vm162_vm0, %v2576_v27  ;;  %v2580_v48 = vld [vmem:[%s2691_s21 + $0x20] sm:$0xff]  ;;  %v2581_v10 = vld [vmem:[%s2691_s21 + $0x28] sm:$0xff]  ;;  %v2583_v27 = vld [vmem:[%s2691_s21 + $0x38] sm:$0xff] }
 0x7bb   :  { %v1455_v9 = vsub.f32 1.5, %v1454_v6  ;;  %v1505_v17 = vmul.f32 %v3419_v58, %v1494_v7  ;;  %v2589_v7 = vld [vmem:[%s2696_s25 + $0x28] sm:$0xff] }
 0x7bc   :  { %v2543_v29 = vpop.eup %2542  ;;  %v1409_v39 = vadd.f32 1e-05, %v1401_v3  ;;  %v1515_v0 = vadd.f32 %v3426_v5, %v1504_v21  ;;  %v2582_v21 = vld [vmem:[%s2691_s21 + $0x30] sm:$0xff]  ;;  %s3655_s21 = sld [smem:[#allocation23_spill]] }
 0x7bd   :  { %v1456_v14 = vmul.f32 %v2541_v34, %v1455_v9  ;;  %v1462_v45 = vmul.f32 %v2543_v29, %v1408_v19  ;;  %v1516_v20 = vadd.f32 %v3426_v5, %v1505_v17  ;;  %vm1468_vm10 = vweird.f32 %v2543_v29 }
 0x7be   :  { %2544 = vrsqrt.f32 %v1409_v39  ;;  %2345 = vmatmul.msk.f32.gmra.mxu3 %vm233_vm1, %v1515_v0  ;;  %vm1469_vm12 = vmor %vm1467_vm11, %vm1468_vm10  ;;  %vm1477_vm14 = vweird.f32 %v1409_v39  ;;  %v2588_v0 = vld [vmem:[%s2696_s25 + $0x20] sm:$0xff] }
 0x7bf   :  { %v1463_v59 = vmul.f32 %v2543_v29, %v1462_v45  ;;  %v1460_v51 = vsel %vm1459_vm9, %v2541_v34, %v1456_v14  ;;  %v2590_v14 = vld [vmem:[%s2696_s25 + $0x30] sm:$0xff]  ;;  %v2591_v45 = vld [vmem:[%s2696_s25 + $0x38] sm:$0xff] }
 0x7c0   :  { %v1495_v28 = vmul.f32 %v1460_v51, %v3392_v35 }
 0x7c1   :  { %v1464_v47 = vmul.f32 0.5, %v1463_v59  ;;  %v1394_v36 = vpop.xlane.xlu2 %1393 }
 0x7c2   :  { %v1402_v22 = vmul.f32 %v1394_v36, %v3101_v12  ;;  %2352 = vmatmul.msk.f32.gmra.mxu2 %vm162_vm0, %v2577_v24  ;;  %v1506_v15 = vmul.f32 %v3419_v58, %v1495_v28 }
 0x7c3   :  { %v1465_v42 = vsub.f32 1.5, %v1464_v47 }
 0x7c4   :  { %v2545_v23 = vpop.eup %2544  ;;  %v1410_v57 = vadd.f32 1e-05, %v1402_v22  ;;  %v1517_v35 = vadd.f32 %v3426_v5, %v1506_v15 }
 0x7c5   :  { %v1466_v43 = vmul.f32 %v2543_v29, %v1465_v42  ;;  %v1472_v16 = vmul.f32 %v2545_v23, %v1409_v39  ;;  %vm1478_vm13 = vweird.f32 %v2545_v23  ;;  %v2587_v39 = vld [vmem:[%s2696_s25 + $0x18] sm:$0xff] }
 0x7c6   :  { %2546 = vrsqrt.f32 %v1410_v57  ;;  %2346 = vmatmul.msk.f32.gmra.mxu3 %vm233_vm1, %v1516_v20  ;;  %vm1479_vm15 = vmor %vm1477_vm14, %vm1478_vm13  ;;  %vm1487_vm4 = vweird.f32 %v1410_v57 }
 0x7c7   :  { %v1473_v53 = vmul.f32 %v2545_v23, %v1472_v16  ;;  %v1470_v32 = vsel %vm1469_vm12, %v2543_v29, %v1466_v43  ;;  %v2586_v29 = vld [vmem:[%s2696_s25 + $0x10] sm:$0xff]  ;;  %vm2149_vm12 = vcmask 130048  }
 0x7c8   :  { %v1496_v40 = vmul.f32 %v1470_v32, %v3404_v41 }
 0x7c9   :  { %v1474_v38 = vmul.f32 0.5, %v1473_v53 }
 0x7ca   :  { %2353 = vmatmul.msk.f32.gmra.mxu2 %vm162_vm0, %v2578_v55  ;;  %v1507_v49 = vmul.f32 %v3419_v58, %v1496_v40 }
 0x7cb   :  { %v1475_v61 = vsub.f32 1.5, %v1474_v38 }
 0x7cc   :  { %v2547_v25 = vpop.eup %2546  ;;  %v1518_v41 = vadd.f32 %v3426_v5, %v1507_v49 }
 0x7cd   :  { %v1476_v26 = vmul.f32 %v2545_v23, %v1475_v61  ;;  %v1482_v54 = vmul.f32 %v2547_v25, %v1410_v57  ;;  %vm1488_vm3 = vweird.f32 %v2547_v25 }
 0x7ce   :  { %2347 = vmatmul.msk.f32.gmra.mxu3 %vm233_vm1, %v1517_v35  ;;  %vm1489_vm5 = vmor %vm1487_vm4, %vm1488_vm3  ;;  %v1595_v17 = vpop.f32.mrf.mxu3 }
 0x7cf   :  { %v1483_v34 = vmul.f32 %v2547_v25, %v1482_v54  ;;  %v1480_v19 = vsel %vm1479_vm15, %v2545_v23, %v1476_v26 }
 0x7d0   :  { %v1497_v63 = vmul.f32 %v1480_v19, %v3416_v44 }
 0x7d1   :  { %v1484_v18 = vmul.f32 0.5, %v1483_v34 }
 0x7d2   :  { %2354 = vmatmul.msk.f32.gmra.mxu2 %vm162_vm0, %v2579_v56  ;;  %v1508_v33 = vmul.f32 %v3419_v58, %v1497_v63 }
 0x7d3   :  { %v1485_v13 = vsub.f32 1.5, %v1484_v18 }
 0x7d4   :  { %v1519_v31 = vadd.f32 %v3426_v5, %v1508_v33 }
 0x7d5   :  { %v1486_v50 = vmul.f32 %v2547_v25, %v1485_v13 }
 0x7d6   :  { %2348 = vmatmul.msk.f32.gmra.mxu3 %vm233_vm1, %v1518_v41 }
 0x7d7   :  { %v1490_v1 = vsel %vm1489_vm5, %v2547_v25, %v1486_v50 }
 0x7d8   :  { %v1498_v6 = vmul.f32 %v1490_v1, %v3431_v11 }
 0x7da   :  { %2355 = vmatmul.msk.f32.gmra.mxu2 %vm162_vm0, %v2580_v48  ;;  %v1509_v44 = vmul.f32 %v3419_v58, %v1498_v6  ;;  %v2584_v58 = vld [vmem:[%s2696_s25] sm:$0xff] }
 0x7dc   :  { %v1520_v3 = vadd.f32 %v3426_v5, %v1509_v44  ;;  %v2585_v5 = vld [vmem:[%s2696_s25 + $0x8] sm:$0xff]  ;;  %s3656_s25 = sld [smem:[#allocation25_spill]] }
 0x7de   :  { %2349 = vmatmul.msk.f32.gmra.mxu3 %vm233_vm1, %v1519_v31  ;;  %v1598_v22 = vpop.f32.mrf.mxu3 }
 0x7e2   :  { %2356 = vmatmul.msk.f32.gmra.mxu2 %vm162_vm0, %v2581_v10 }
 0x7e6   :  { %2350 = vmatmul.msk.f32.gmra.mxu3 %vm233_vm1, %v1520_v3 }
 0x7ea   :  { %2357 = vmatmul.msk.f32.gmra.mxu2 %vm162_vm0, %v2582_v21 }
 0x7f2   :  { %2358 = vmatmul.msk.f32.gmra.mxu2 %vm162_vm0, %v2583_v27 }
 0x82b   :  { %v1662_v11 = vpop.permute.xlu0 %1661 }
 0x82c   :  { %v1706_v9 = vpop.permute.xlu1 %1705  ;;  %1679 = vmatpush.msra.mxu0 %v1662_v11 }
 0x82d   :  { %1723 = vmatpush.msra.mxu1 %v1706_v9  ;;  %2359 = vmatmul.msk.f32.vlgmr.msra.gmra.mxu0 %vm162_vm0, %v2584_v58 }
 0x82e   :  { %2367 = vmatmul.msk.f32.vlgmr.msra.gmra.mxu1 %vm162_vm0, %v2584_v58 }
 0x835   :  { %2360 = vmatmul.msk.f32.gmra.mxu0 %vm162_vm0, %v2585_v5 }
 0x836   :  { %2368 = vmatmul.msk.f32.gmra.mxu1 %vm162_vm0, %v2585_v5 }
 0x83d   :  { %2361 = vmatmul.msk.f32.gmra.mxu0 %vm162_vm0, %v2586_v29  ;;  %v1636_v59 = vpop.f32.mrf.mxu2 }
 0x83e   :  { %2369 = vmatmul.msk.f32.gmra.mxu1 %vm162_vm0, %v2586_v29 }
 0x841   :  { %v1601_v28 = vpop.f32.mrf.mxu3 }
 0x845   :  { %2362 = vmatmul.msk.f32.gmra.mxu0 %vm162_vm0, %v2587_v39  ;;  %v1639_v51 = vpop.f32.mrf.mxu2 }
 0x846   :  { %2370 = vmatmul.msk.f32.gmra.mxu1 %vm162_vm0, %v2587_v39 }
 0x849   :  { %v1604_v55 = vpop.f32.mrf.mxu3 }
 0x84d   :  { %2363 = vmatmul.msk.f32.gmra.mxu0 %vm162_vm0, %v2588_v0  ;;  %v1642_v42 = vpop.f32.mrf.mxu2 }
 0x84e   :  { %2371 = vmatmul.msk.f32.gmra.mxu1 %vm162_vm0, %v2588_v0 }
 0x851   :  { %v1607_v34 = vpop.f32.mrf.mxu3 }
 0x855   :  { %2364 = vmatmul.msk.f32.gmra.mxu0 %vm162_vm0, %v2589_v7  ;;  %v1645_v53 = vpop.f32.mrf.mxu2 }
 0x856   :  { %2372 = vmatmul.msk.f32.gmra.mxu1 %vm162_vm0, %v2589_v7 }
 0x859   :  { %v1610_v41 = vpop.f32.mrf.mxu3 }
 0x85d   :  { %2365 = vmatmul.msk.f32.gmra.mxu0 %vm162_vm0, %v2590_v14  ;;  %v1648_v35 = vpop.f32.mrf.mxu2 }
 0x85e   :  { %2373 = vmatmul.msk.f32.gmra.mxu1 %vm162_vm0, %v2590_v14 }
 0x861   :  { %v1613_v44 = vpop.f32.mrf.mxu3 }
 0x865   :  { %2366 = vmatmul.msk.f32.gmra.mxu0 %vm162_vm0, %v2591_v45  ;;  %v1651_v18 = vpop.f32.mrf.mxu2 }
 0x866   :  { %2374 = vmatmul.msk.f32.gmra.mxu1 %vm162_vm0, %v2591_v45 }
 0x869   :  { %v1616_v58 = vpop.f32.mrf.mxu3 }
 0x86d   :  { %v1654_v1 = vpop.f32.mrf.mxu2 }
 0x875   :  { %v1657_v21 = vpop.f32.mrf.mxu2 }
 0x8aa   :  { %v1681_v47 = vpop.f32.mrf.mxu0 }
 0x8ab   :  { %v1749_v36 = vmul.f32 %v1681_v47, %v1636_v59  ;;  %v1725_v29 = vpop.f32.mrf.mxu1 }
 0x8ad   :  { %v1757_v24 = vmul.f32 0.35355338, %v1749_v36 }
 0x8af   :  { %v1765_v23 = vmul.f32 %v1757_v24, %v1595_v17 }
 0x8b1   :  { %2375 = vmatmul.msk.f32.vlgmr.msrb.gmra.mxu3 %vm233_vm1, %v1765_v23 }
 0x8b2   :  { %v1684_v57 = vpop.f32.mrf.mxu0 }
 0x8b3   :  { %v1750_v20 = vmul.f32 %v1684_v57, %v1639_v51  ;;  %v3528_v14 = vpop.f32.mrf.mxu1 }
 0x8b5   :  { %v1758_v43 = vmul.f32 0.35355338, %v1750_v20 }
 0x8b7   :  { %v1766_v16 = vmul.f32 %v1758_v43, %v1598_v22 }
 0x8b9   :  { %2376 = vmatmul.msk.f32.gmra.mxu3 %vm233_vm1, %v1766_v16 }
 0x8ba   :  { %v1687_v15 = vpop.f32.mrf.mxu0 }
 0x8bb   :  { %v1751_v32 = vmul.f32 %v1687_v15, %v1642_v42  ;;  %v1731_v36 = vpop.f32.mrf.mxu1 }
 0x8bd   :  { %v1759_v38 = vmul.f32 0.35355338, %v1751_v32 }
 0x8bf   :  { %v1767_v61 = vmul.f32 %v1759_v38, %v1601_v28 }
 0x8c1   :  { %2377 = vmatmul.msk.f32.gmra.mxu3 %vm233_vm1, %v1767_v61 }
 0x8c2   :  { %v1690_v25 = vpop.f32.mrf.mxu0 }
 0x8c3   :  { %v1752_v40 = vmul.f32 %v1690_v25, %v1645_v53  ;;  %v1734_v24 = vpop.f32.mrf.mxu1 }
 0x8c5   :  { %v1760_v26 = vmul.f32 0.35355338, %v1752_v40 }
 0x8c7   :  { %v1768_v54 = vmul.f32 %v1760_v26, %v1604_v55 }
 0x8c9   :  { %2378 = vmatmul.msk.f32.gmra.mxu3 %vm233_vm1, %v1768_v54 }
 0x8ca   :  { %v1693_v49 = vpop.f32.mrf.mxu0 }
 0x8cb   :  { %v1753_v19 = vmul.f32 %v1693_v49, %v1648_v35  ;;  %v1737_v23 = vpop.f32.mrf.mxu1 }
 0x8cd   :  { %v1761_v56 = vmul.f32 0.35355338, %v1753_v19 }
 0x8cf   :  { %v1769_v13 = vmul.f32 %v1761_v56, %v1607_v34 }
 0x8d1   :  { %2379 = vmatmul.msk.f32.gmra.mxu3 %vm233_vm1, %v1769_v13 }
 0x8d2   :  { %v1696_v63 = vpop.f32.mrf.mxu0 }
 0x8d3   :  { %v1754_v50 = vmul.f32 %v1696_v63, %v1651_v18  ;;  %v1740_v20 = vpop.f32.mrf.mxu1 }
 0x8d5   :  { %v1762_v33 = vmul.f32 0.35355338, %v1754_v50 }
 0x8d7   :  { %v1770_v48 = vmul.f32 %v1762_v33, %v1610_v41 }
 0x8d9   :  { %2380 = vmatmul.msk.f32.gmra.mxu3 %vm233_vm1, %v1770_v48 }
 0x8da   :  { %v1699_v31 = vpop.f32.mrf.mxu0 }
 0x8db   :  { %v1755_v6 = vmul.f32 %v1699_v31, %v1654_v1  ;;  %v1743_v61 = vpop.f32.mrf.mxu1 }
 0x8dd   :  { %v1763_v10 = vmul.f32 0.35355338, %v1755_v6 }
 0x8df   :  { %v1771_v3 = vmul.f32 %v1763_v10, %v1613_v44 }
 0x8e1   :  { %2381 = vmatmul.msk.f32.gmra.mxu3 %vm233_vm1, %v1771_v3 }
 0x8e2   :  { %v1702_v27 = vpop.f32.mrf.mxu0 }
 0x8e3   :  { %v1756_v11 = vmul.f32 %v1702_v27, %v1657_v21  ;;  %v1746_v13 = vpop.f32.mrf.mxu1 }
 0x8e5   :  { %v1764_v9 = vmul.f32 0.35355338, %v1756_v11  ;;  %v2395_v11 = vld [vmem:[%s2731_s30 + $0x30] sm:$0xff] }
 0x8e7   :  { %v1772_v5 = vmul.f32 %v1764_v9, %v1616_v58  ;;  %v2394_v9 = vld [vmem:[%s2731_s30 + $0x28] sm:$0xff]  ;;  %v2393_v58 = vld [vmem:[%s2731_s30 + $0x20] sm:$0xff] }
 0x8e9   :  { %2382 = vmatmul.msk.f32.gmra.mxu3 %vm233_vm1, %v1772_v5 }
 0x934   :  { %v1814_v39 = vpop.f32.mrf.mxu3 }
 0x935   :  { %v2383_v0 = vclamps-f32 %v1814_v39, 5.0 }
 0x937   :  { %v1854_v7 = vmul.f32 1.442695, %v2383_v0 }
 0x939   :  { %2548 = vpow2.f32 %v1854_v7 }
 0x93c   :  { %v1817_v45 = vpop.f32.mrf.mxu3 }
 0x93d   :  { %v2384_v26 = vclamps-f32 %v1817_v45, 5.0 }
 0x93f   :  { %v2549_v59 = vpop.eup %2548  ;;  %v1856_v19 = vmul.f32 1.442695, %v2384_v26 }
 0x940   :  { %v3531_v17 = vmul.f32 %v2549_v59, %v3034_v4 }
 0x942   :  { %v3534_v51 = vmul.f32 %v3531_v17, %v1725_v29 }
 0x944   :  { %v1820_v47 = vpop.f32.mrf.mxu3 }
 0x945   :  { %v2385_v25 = vclamps-f32 %v1820_v47, 5.0 }
 0x947   :  { %v1858_v34 = vmul.f32 1.442695, %v2385_v25 }
 0x94c   :  { %v1823_v22 = vpop.f32.mrf.mxu3 }
 0x94d   :  { %v2386_v4 = vclamps-f32 %v1823_v22, 5.0 }
 0x94f   :  { %v1860_v54 = vmul.f32 1.442695, %v2386_v4  ;;  %v2410_v4 = vld [vmem:[%s3643_s18 + $0x58] sm:$0xff] }
 0x954   :  { %v1826_v42 = vpop.f32.mrf.mxu3 }
 0x955   :  { %v2387_v53 = vclamps-f32 %v1826_v42, 5.0 }
 0x957   :  { %v1862_v35 = vmul.f32 1.442695, %v2387_v53 }
 0x95c   :  { %v1829_v57 = vpop.f32.mrf.mxu3 }
 0x95d   :  { %v2388_v16 = vclamps-f32 %v1829_v57, 5.0  ;;  %v2403_v57 = vld [vmem:[%s3637_s17 + $0x30] sm:$0xff] }
 0x95f   :  { %v1864_v32 = vmul.f32 1.442695, %v2388_v16  ;;  %v2412_v16 = vld [vmem:[%s3643_s18 + $0x68] sm:$0xff] }
 0x964   :  { %v1832_v28 = vpop.f32.mrf.mxu3 }
 0x965   :  { %v2389_v43 = vclamps-f32 %v1832_v28, 5.0  ;;  %v2414_v28 = vld [vmem:[%s3643_s18 + $0x78] sm:$0xff] }
 0x967   :  { %v1866_v15 = vmul.f32 1.442695, %v2389_v43  ;;  %v2413_v43 = vld [vmem:[%s3643_s18 + $0x70] sm:$0xff] }
 0x969   :  { %2550 = vpow2.f32 %v1866_v15 }
 0x96a   :  { %2552 = vpow2.f32 %v1864_v32  ;;  %v2411_v32 = vld [vmem:[%s3643_s18 + $0x60] sm:$0xff] }
 0x96c   :  { %v1835_v38 = vpop.f32.mrf.mxu3 }
 0x96d   :  { %v2390_v55 = vclamps-f32 %v1835_v38, 5.0 }
 0x96f   :  { %v1868_v40 = vmul.f32 1.442695, %v2390_v55  ;;  %v2551_v49 = vpop.eup %2550 }
 0x970   :  { %v2553_v18 = vpop.eup %2552  ;;  %v1876_v41 = vmul.f32 %v2551_v49, %v3018_v8  ;;  %v2487_v49 = vld [vmem:[%s3640_s12 + $0x1] ss:$0 sm:$0xff] }
 0x971   :  { %2554 = vpow2.f32 %v1868_v40  ;;  %v1875_v33 = vmul.f32 %v2553_v18, %v3016_v2 }
 0x972   :  { %2556 = vpow2.f32 %v1862_v35  ;;  %v1884_v6 = vmul.f32 %v1876_v41, %v1743_v61 }
 0x973   :  { %2558 = vpow2.f32 %v1860_v54  ;;  %v1883_v3 = vmul.f32 %v1875_v33, %v1740_v20  ;;  %v2401_v20 = vld [vmem:[%s3637_s17 + $0x20] sm:$0xff] }
 0x974   :  { %2560 = vpow2.f32 %v1858_v34  ;;  %v2486_v54 = vld [vmem:[%s3639_s8 + $0x1] ss:$0 sm:$0xff] }
 0x975   :  { %2562 = vpow2.f32 %v1856_v19 }
 0x977   :  { %v2555_v56 = vpop.eup %2554 }
 0x978   :  { %v1877_v63 = vmul.f32 %v2555_v56, %v3014_v60  ;;  %v2557_v50 = vpop.eup %2556 }
 0x979   :  { %v2559_v48 = vpop.eup %2558  ;;  %v1874_v31 = vmul.f32 %v2557_v50, %v3020_v30  ;;  %v2488_v50 = vld [vmem:[%s3645_s23 + $0x1] ss:$0 sm:$0xff] }
 0x97a   :  { %v1885_v1 = vmul.f32 %v1877_v63, %v1746_v13  ;;  %1914 = vmatpush.msrb.mxu0 %v1877_v63  ;;  %v2561_v44 = vpop.eup %2560  ;;  %v1873_v10 = vmul.f32 %v2559_v48, %v3027_v46  ;;  %v2409_v13 = vld [vmem:[%s3643_s18 + $0x50] sm:$0xff]  ;;  %v2407_v63 = vld [vmem:[%s3643_s18 + $0x40] sm:$0xff] }
 0x97b   :  { %v2563_v8 = vpop.eup %2562  ;;  %v1872_v60 = vmul.f32 %v2561_v44, %v3022_v37  ;;  %v1882_v21 = vmul.f32 %v1874_v31, %v1737_v23  ;;  %v2592_v37 = vld [vmem:[%s2701_s29] sm:$0xff]  ;;  %v2404_v23 = vld [vmem:[%s3637_s17 + $0x38] sm:$0xff]  ;;  %s3657_s29 = sld [smem:[#allocation24_spill]] }
 0x97c   :  { %1894 = vmatpush.msra.mxu2 %v1885_v1  ;;  %1915 = vmatpush.msrb.mxu0 %v1876_v41  ;;  %v1871_v2 = vmul.f32 %v2563_v8, %v3031_v62  ;;  %v1881_v30 = vmul.f32 %v1873_v10, %v1734_v24  ;;  %v2396_v62 = vld [vmem:[%s2731_s30 + $0x38] sm:$0xff]  ;;  %v2408_v41 = vld [vmem:[%s3643_s18 + $0x48] sm:$0xff]  ;;  %s2662_s30 = smov [#allocation2]  }
 0x97d   :  { %v1880_v27 = vmul.f32 %v1872_v60, %v1731_v36  ;;  %s2206_s7 = sshll.u32 %s2662_s30, 4  ;;  %s2207_s7 = int_to_ptr.vmem [resolvable:$true] %s2206_s7 }
 0x97e   :  { %1895 = vmatpush.msra.mxu2 %v1884_v6  ;;  %1916 = vmatpush.msrb.mxu0 %v1875_v33  ;;  %v1879_v46 = vmul.f32 %v1871_v2, %v3528_v14  ;;  %v2485_v14 = vld [vmem:[%s3636_s13 + $0x1] ss:$0 sm:$0xff] }
 0x980   :  { %1896 = vmatpush.msra.mxu2 %v1883_v3  ;;  %1917 = vmatpush.msrb.mxu0 %v1874_v31  ;;  %v2489_v31 = vld [vmem:[%s3647_s28 + $0x1] ss:$0 sm:$0xff] }
 0x982   :  { %1897 = vmatpush.msra.mxu2 %v1882_v21  ;;  %1918 = vmatpush.msrb.mxu0 %v1873_v10 }
 0x984   :  { %1898 = vmatpush.msra.mxu2 %v1881_v30  ;;  %1919 = vmatpush.msrb.mxu0 %v1872_v60 }
 0x986   :  { %1899 = vmatpush.msra.mxu2 %v1880_v27  ;;  %1920 = vmatpush.msrb.mxu0 %v1871_v2 }
 0x988   :  { %1900 = vmatpush.msra.mxu2 %v1879_v46  ;;  %1921 = vmatpush.msrb.mxu0 %v3531_v17 }
 0x989   :  { %2392 = vmatmul.msk.f32.vlgmr.msrb.gmra.mxu0 %vm681_vm2, %v2592_v37 }
 0x98a   :  { %1901 = vmatpush.msra.mxu2 %v3534_v51  ;;  %2055 = vmatpush.msra.mxu0 %v2414_v28 }
 0x98b   :  { %2391 = vmatmul.msk.f32.vlgmr.msra.gmra.mxu2 %vm681_vm2, %v2592_v37 }
 0x98c   :  { %1953 = vmatpush.msrb.mxu2 %v2396_v62  ;;  %2056 = vmatpush.msra.mxu0 %v2413_v43  ;;  %v2120_v62 = vld [vmem:[%s3655_s21 + $0x18] sm:$0xff] }
 0x98e   :  { %1954 = vmatpush.msrb.mxu2 %v2395_v11  ;;  %2057 = vmatpush.msra.mxu0 %v2412_v16  ;;  %v2119_v11 = vld [vmem:[%s3655_s21 + $0x10] sm:$0xff] }
 0x990   :  { %1955 = vmatpush.msrb.mxu2 %v2394_v9  ;;  %2058 = vmatpush.msra.mxu0 %v2411_v32  ;;  %v2118_v9 = vld [vmem:[%s3655_s21 + $0x8] sm:$0xff] }
 0x992   :  { %1956 = vmatpush.msrb.mxu2 %v2393_v58  ;;  %2059 = vmatpush.msra.mxu0 %v2410_v4  ;;  %v2117_v58 = vld [vmem:[%s3655_s21] sm:$0xff]  ;;  %v2147_v4 = vld [vmem:[%s3656_s25 + $0x8] sm:$0xff] }
 0x993   :  { %2167 = vmatpush.msrb.mxu1 %v2147_v4 }
 0x994   :  { %2021 = vmatpush.msra.mxu2 %v2404_v23  ;;  %2060 = vmatpush.msra.mxu0 %v2409_v13 }
 0x996   :  { %2022 = vmatpush.msra.mxu2 %v2403_v57  ;;  %2061 = vmatpush.msra.mxu0 %v2408_v41 }
 0x998   :  { %2062 = vmatpush.msra.mxu0 %v2407_v63 }
 0xa06   :  { %v1923_v5 = vpop.f32.mrf.mxu0 }
 0xa07   :  { %v1924_v29 = vadd.f32 1e-06, %v1923_v5 }
 0xa09   :  { %2564 = vrcp.f32 %v1924_v29 }
 0xa0e   :  { %v1903_v39 = vpop.f32.mrf.mxu2 }
 0xa0f   :  { %v2565_v0 = vpop.eup %2564 }
 0xa10   :  { %v1927_v7 = vmul.f32 %v2565_v0, %v1903_v39  ;;  %v2661_v0 = vmov 8.0  }
 0xa12   :  { %2398 = vmatmul.msk.f32.vlgmr.msrb.gmra.mxu2 %vm233_vm1, %v1927_v7 }
 0xa95   :  { %v1958_v45 = vpop.f32.mrf.mxu2 }
 0xa96   :  { %v1959_v59 = vadd.f32 %v2485_v14, %v1958_v45 }
 0xa98   :  { %v1961_v17 = vadd.f32 %v1959_v59, %v3406_v52  ;;  %v2402_v52 = vld [vmem:[%s3637_s17 + $0x28] sm:$0xff]  ;;  %v2490_v59 = vld [vmem:[%s3649_s19 + $0x1] ss:$0 sm:$0xff] }
 0xa99   :  { %2023 = vmatpush.msra.mxu2 %v2402_v52 }
 0xa9a   :  { %v1966_v51 = vsel %vm233_vm1, %v1961_v17, 0.0 }
 0xa9b   :  { %1967 = vadd.xlane.f32.xlu0 %v1966_v51  ;;  %2024 = vmatpush.msra.mxu2 %v2401_v20  ;;  %v2491_v51 = vld [vmem:[%s3650_s24 + $0x1] ss:$0 sm:$0xff] }
 0xa9d   :  { %2137 = vmatpush.msrb.mxu2 %v2120_v62 }
 0xa9f   :  { %2138 = vmatpush.msrb.mxu2 %v2119_v11 }
 0xaa1   :  { %2139 = vmatpush.msrb.mxu2 %v2118_v9 }
 0xaa3   :  { %2140 = vmatpush.msrb.mxu2 %v2117_v58 }
 0xb0e   :  { %v1968_v47 = vpop.xlane.xlu0 %1967 }
 0xb0f   :  { %v1969_v36 = vmul.f32 %v1968_v47, %v3101_v12 }
 0xb11   :  { %v1970_v22 = vsub.f32 %v1961_v17, %v1969_v36 }
 0xb13   :  { %v1971_v24 = vmul.f32 %v1970_v22, %v1970_v22 }
 0xb15   :  { %v1972_v42 = vsel %vm233_vm1, %v1971_v24, 0.0 }
 0xb16   :  { %1973 = vadd.xlane.f32.xlu2 %v1972_v42 }
 0xb89   :  { %v1974_v53 = vpop.xlane.xlu2 %1973 }
 0xb8a   :  { %v1975_v15 = vmul.f32 %v1974_v53, %v3101_v12 }
 0xb8c   :  { %v1976_v38 = vadd.f32 1e-05, %v1975_v15 }
 0xb8e   :  { %2566 = vrsqrt.f32 %v1976_v38  ;;  %vm1983_vm7 = vweird.f32 %v1976_v38 }
 0xb94   :  { %v2567_v55 = vpop.eup %2566 }
 0xb95   :  { %v1978_v61 = vmul.f32 %v2567_v55, %v1976_v38  ;;  %vm1984_vm6 = vweird.f32 %v2567_v55 }
 0xb96   :  { %vm1985_vm8 = vmor %vm1983_vm7, %vm1984_vm6 }
 0xb97   :  { %v1979_v25 = vmul.f32 %v2567_v55, %v1978_v61  ;;  %v2121_v61 = vld [vmem:[%s3657_s29] sm:$0x1] }
 0xb99   :  { %v1980_v35 = vmul.f32 0.5, %v1979_v25 }
 0xb9b   :  { %v1981_v40 = vsub.f32 1.5, %v1980_v35 }
 0xb9d   :  { %v1982_v26 = vmul.f32 %v2567_v55, %v1981_v40 }
 0xb9f   :  { %v1986_v34 = vsel %vm1985_vm8, %v2567_v55, %v1982_v26  ;;  %v2146_v55 = vld [vmem:[%s3656_s25] sm:$0xff] }
 0xba0   :  { %v1987_v19 = vmul.f32 %v1986_v34, %v1970_v22  ;;  %2168 = vmatpush.msrb.mxu1 %v2146_v55  ;;  %v2174_v26 = vld [vmem:[%s2851_s27] sm:$0xff]  ;;  %s2605_s27 = sshra.s32 %s2209_s10, 4  ;;  %s2606_s27 = int_to_ptr.hbm [resolvable:$true] %s2605_s27 }
 0xba1   :  { %p2610_p1 = scmp.lt.s32.totalorder %s2606_s27, %s2861_s6 }
 0xba2   :  { %v1991_v18 = vmul.f32 %v2486_v54, %v1987_v19  ;;  %v2148_v54 = vld [vmem:[%s2846_s20] sm:$0x1]  ;;  %s2607_s20 = scalar_lea.hbm %s2606_s27, 1 }
 0xba3   :  { %p2608_p0 = scmp.ne.s32.totalorder %s2606_s27, %s2607_s20  ;;  %p2611_p2 = scmp.lt.s32.totalorder %s2609_s11, %s2607_s20 }
 0xba4   :  { %v1995_v56 = vadd.f32 %v2487_v49, %v1991_v18  ;;  %v2175_v18 = vld [vmem:[%s2856_s4] sm:$0x1] }
 0xba5   :  { %p2612_p3 = por %p2611_p2, %p2610_p1 }
 0xba6   :  { %2406 = vmatmul.msk.f32.vlgmr.msra.gmra.mxu2 %vm233_vm1, %v1995_v56 }
 0xba7   :  { %2194 = vmatpush.msra.mxu2 %v2174_v26  ;;  %p2613_p4 = pnand %p2612_p3, %p2608_p0 }
 0xc29   :  { %v2026_v33 = vpop.f32.mrf.mxu2 }
 0xc2a   :  { %v2027_v1 = vadd.f32 %v2488_v50, %v2026_v33 }
 0xc2c   :  { %v2029_v48 = vmax.f32 %v2027_v1, 0.0 }
 0xc2e   :  { %2416 = vmatmul.msk.f32.vlgmr.msra.gmra.mxu0 %vm681_vm2, %v2029_v48 }
 0xcab   :  { %v2064_v6 = vpop.f32.mrf.mxu0 }
 0xcac   :  { %v2065_v44 = vadd.f32 %v2489_v31, %v2064_v6 }
 0xcae   :  { %v2067_v10 = vadd.f32 %v2065_v44, %v1995_v56 }
 0xcb0   :  { %v2072_v3 = vsel %vm233_vm1, %v2067_v10, 0.0 }
 0xcb1   :  { %2073 = vadd.xlane.f32.xlu2 %v2072_v3 }
 0xd24   :  { %v2074_v8 = vpop.xlane.xlu2 %2073 }
 0xd25   :  { %v2075_v60 = vmul.f32 %v2074_v8, %v3101_v12 }
 0xd27   :  { %v2076_v21 = vsub.f32 %v2067_v10, %v2075_v60 }
 0xd29   :  { %v2077_v2 = vmul.f32 %v2076_v21, %v2076_v21 }
 0xd2b   :  { %v2078_v30 = vsel %vm233_vm1, %v2077_v2, 0.0 }
 0xd2c   :  { %2079 = vadd.xlane.f32.xlu2 %v2078_v30 }
 0xd9f   :  { %v2080_v27 = vpop.xlane.xlu2 %2079 }
 0xda0   :  { %v2081_v46 = vmul.f32 %v2080_v27, %v3101_v12 }
 0xda2   :  { %v2082_v37 = vadd.f32 1e-05, %v2081_v46 }
 0xda4   :  { %2568 = vrsqrt.f32 %v2082_v37  ;;  %vm2089_vm9 = vweird.f32 %v2082_v37 }
 0xda5   :  { %2570 = vrcp.f32 %v2661_v0 }
 0xdaa   :  { %v2569_v5 = vpop.eup %2568 }
 0xdab   :  { %v2084_v29 = vmul.f32 %v2569_v5, %v2082_v37  ;;  %vm2090_vm2 = vweird.f32 %v2569_v5  ;;  %v2571_v12 = vpop.eup %2570 }
 0xdac   :  { %vm2091_vm10 = vmor %vm2089_vm9, %vm2090_vm2  ;;  %v2110_v36 = vmul.f32 8.0, %v2571_v12  ;;  %vm2114_vm11 = vweird.f32 %v2571_v12 }
 0xdad   :  { %v2085_v39 = vmul.f32 %v2569_v5, %v2084_v29 }
 0xdae   :  { %v2111_v42 = vsub.f32 1.0, %v2110_v36 }
 0xdaf   :  { %v2086_v7 = vmul.f32 0.5, %v2085_v39 }
 0xdb0   :  { %v2112_v52 = vmul.f32 %v2571_v12, %v2111_v42 }
 0xdb1   :  { %v2087_v14 = vsub.f32 1.5, %v2086_v7 }
 0xdb2   :  { %v2113_v43 = vadd.f32 %v2571_v12, %v2112_v52 }
 0xdb3   :  { %v2088_v45 = vmul.f32 %v2569_v5, %v2087_v14 }
 0xdb4   :  { %v2115_v15 = vsel %vm2114_vm11, %v2571_v12, %v2113_v43 }
 0xdb5   :  { %v2092_v17 = vsel %vm2091_vm10, %v2569_v5, %v2088_v45 }
 0xdb6   :  { %v2093_v47 = vmul.f32 %v2092_v17, %v2076_v21 }
 0xdb8   :  { %v2097_v22 = vmul.f32 %v2490_v59, %v2093_v47 }
 0xdba   :  { %v2101_v24 = vadd.f32 %v2491_v51, %v2097_v22 }
 0xdbc   :  { %v2102_v23 = vsel %vm233_vm1, %v2101_v24, 0.0 }
 0xdbd   :  { %v2103_v57 = vrot.slane %v2102_v23, 4 }
 0xdbf   :  { %v2104_v20 = vadd.f32 %v2103_v57, %v2102_v23 }
 0xdc1   :  { %v2105_v28 = vrot.slane %v2104_v20, 2 }
 0xdc3   :  { %v2106_v16 = vadd.f32 %v2105_v28, %v2104_v20 }
 0xdc5   :  { %v2107_v53 = vrot.slane %v2106_v16, 1 }
 0xdc7   :  { %v2108_v32 = vadd.f32 %v2107_v53, %v2106_v16 }
 0xdc9   :  { %v2116_v38 = vmul.f32 %v2115_v15, %v2108_v32 }
 0xdcb   :  { %2419 = vmatmul.msk.f32.vlgmr.msrb.gmra.mxu2 %vm233_vm1, %v2116_v38  ;;  %vm2199_vm1 = vcmask 16384  }
 0xe4e   :  { %v2142_v25 = vpop.f32.mrf.mxu2 }
 0xe4f   :  { %v2143_v35 = vadd.f32 %v2142_v25, %v2121_v61 }
 0xe51   :  { %v2145_v40 = vmax.f32 %v2143_v35, 0.0 }
 0xe53   :  { %2420 = vmatmul.msk.f32.vlgmr.msrb.gmra.mxu1 %vm2149_vm12, %v2145_v40 }
 0xed0   :  { %v2170_v34 = vpop.f32.mrf.mxu1 }
 0xed1   :  { %v2171_v49 = vadd.f32 %v2170_v34, %v2148_v54 }
 0xed3   :  { %v2173_v19 = vmax.f32 %v2171_v49, 0.0 }
 0xed5   :  { %2421 = vmatmul.msk.f32.vlgmr.msra.gmra.mxu2 %vm162_vm0, %v2173_v19 }
 0xf58   :  { %v2196_v56 = vpop.f32.mrf.mxu2 }
 0xf59   :  { %v2197_v13 = vadd.f32 %v2196_v56, %v2175_v18 }
 0xf5b   :  { %2200 = vst.msk [vmem:[#allocation2] sm:$0x1] %vm2199_vm1, %v2197_v13 }
 0xf5c   :  { %2616 = shalt.err (!%p2613_p4)
}
 0xf5d   :  { %2211 = dma.vmem_to_hbm [thread:$0]  %s2207_s7, 16, %s2209_s10, [#allocation3]  }
 0xf5e   :  { %2617 = dma.done.wait [#allocation3], 16  }
 0xf5f   :  { %2618 = vsyncadd [#allocation3], 4294967280 }
 0xf60   :  { %2216 = vsyncpa [#allocation3], 1 }

</bundles_post_ra>
